<compile_context>
chip_gen: v7x
topology: tpu7x:2x2x1
jax: 0.10.0
libtpu: 0.0.40
codegen_flags: <defaults>
</compile_context>

<pallas_src>
import jax
import jax.numpy as jnp
import numpy as np
from jax import lax
from jax.experimental import pallas as pl
from jax.experimental.pallas import tpu as pltpu


def _ceil8(n):
    return ((int(n) + 7) // 8) * 8


# ----------------------------- fused Pallas kernel ---------------------------

def _make_fused_kernel(layer_cfgs, hd, L, b_tile):
    """Build the fused conv-stack kernel.

    layer_cfgs: tuple of (cin, cout, k, pad, cin_p, cout_p) static Python ints.
    Kernel refs (in order):
      x_ref                       (1, cin0_p, B_TILE*L)   folded batch block
      w1 ... w5                   (cout_p, k*cin_p + 8)   packed weight+bias
      scale_ref, shift_ref        (hd, 1)                 folded eval BatchNorm
      o_ref                       (1, hd, B_TILE*L)
      colbuf                      VMEM (kc_max + 8, B_TILE*L)   im2col scratch
    """
    n_layers = len(layer_cfgs)
    BL = b_tile * L

    def kernel(*refs):
        x_ref = refs[0]
        w_refs = refs[1:1 + n_layers]
        scale_ref = refs[1 + n_layers]
        shift_ref = refs[2 + n_layers]
        o_ref = refs[3 + n_layers]
        colbuf = refs[4 + n_layers]

        # Hoisted constants (traced once, reused by every unrolled layer/tap).
        # `local` = lane position inside each length-L batch segment.
        local = lax.broadcasted_iota(jnp.int32, (1, BL), 1) % L
        ones8 = jnp.ones((8, BL), jnp.float32)   # bias row (+7 zero-weight rows)

        fmask_cache = {}

        def fmask(s):      # per-segment halo mask for relative tap shift s != 0
            if s not in fmask_cache:
                if s > 0:
                    m = local < (L - s)     # source column l+s must stay < L
                else:
                    m = local >= (-s)       # source column l+s must stay >= 0
                fmask_cache[s] = m.astype(jnp.float32)
            return fmask_cache[s]

        a = x_ref[0]                                     # (cin0_p, B_TILE*L)
        for li, (_, _, k, pad, cin_p, _) in enumerate(layer_cfgs):
            w_ref = w_refs[li]                           # (cout_p, k*cin_p + 8)
            kc = k * cin_p

            # im2col: tap t is the activation shifted by s = t - pad inside
            # each batch segment (XLU rotate + halo mask; no padded buffer,
            # no full-scratch zeroing, every store sublane/lane aligned).
            for t in range(k):
                s = t - pad
                if s == 0:
                    tap = a
                else:
                    tap = pltpu.roll(a, shift=(-s) % BL, axis=1) * fmask(s)
                colbuf[t * cin_p:(t + 1) * cin_p, :] = tap
            colbuf[kc:kc + 8, :] = ones8                 # folded-bias rows

            # One MXU matmul per layer; bias comes from the ones row.
            h = jnp.dot(w_ref[...], colbuf[0:kc + 8, :],
                        preferred_element_type=jnp.float32)
            a = jnp.where(h > 0.0, h, 0.01 * h)          # LeakyReLU(0.01)

        # Eval-mode BatchNorm1d epilogue (must stay AFTER the last LeakyReLU).
        o_ref[0] = a[0:hd, :] * scale_ref[...] + shift_ref[...]

    return kernel


# ------------------------------- JAX wrappers --------------------------------

def prepare_params(conv_params, bn_params, eps=1e-5):
    """One-time packing: channel-pad to x8, fold bias into the weight matrix,
    and fold eval-mode BatchNorm into a per-channel scale/shift."""
    layer_cfgs = []
    packed_ws = []
    for (w, b, pad) in conv_params:
        cout, cin, k = (int(d) for d in w.shape)
        cin_p, cout_p = _ceil8(cin), _ceil8(cout)
        kc = k * cin_p
        # column t*cin_p + ci  <-  w[co, ci, t]  (matches colbuf row order)
        w_t = jnp.transpose(w, (0, 2, 1))                       # (cout, k, cin)
        w_t = jnp.pad(w_t, ((0, 0), (0, 0), (0, cin_p - cin)))  # pad cin -> x8
        wp = jnp.zeros((cout_p, kc + 8), jnp.float32)
        wp = wp.at[:cout, :kc].set(w_t.reshape(cout, kc))
        wp = wp.at[:cout, kc].set(b)                            # folded bias col
        packed_ws.append(wp)
        layer_cfgs.append((cin, cout, k, int(pad), cin_p, cout_p))
    gamma, beta, rmean, rvar = bn_params
    inv = gamma / jnp.sqrt(rvar + eps)
    scale = inv.reshape(-1, 1)
    shift = (beta - rmean * inv).reshape(-1, 1)
    return tuple(layer_cfgs), packed_ws, scale, shift


def cnn_module_forward(x, layer_cfgs, packed_ws, scale, shift, *, b_tile=4):
    """Fused Pallas implementation of CNN_Module.forward (inference semantics).

    x: (N, 1, L) float32  ->  (N, hd, L) float32
    """
    N, cin0, L = (int(d) for d in x.shape)
    hd = layer_cfgs[-1][1]
    cin0_p = layer_cfgs[0][4]
    kc_max = max(k * cp for (_, _, k, _, cp, _) in layer_cfgs)

    # Batch folding: b_tile samples share one grid step, side-by-side on lanes.
    b_tile = max(1, min(b_tile, N))
    G = pl.cdiv(N, b_tile)
    n_pad = G * b_tile
    BL = b_tile * L

    xp = jnp.pad(x.astype(jnp.float32),
                 ((0, n_pad - N), (0, cin0_p - cin0), (0, 0)))
    xf = (xp.reshape(G, b_tile, cin0_p, L)      # layout plumbing outside kernel
            .transpose(0, 2, 1, 3)
            .reshape(G, cin0_p, BL))

    kernel = _make_fused_kernel(layer_cfgs, hd, L, b_tile)

    in_specs = [pl.BlockSpec((1, cin0_p, BL), lambda g: (g, 0, 0))]
    operands = [xf]
    for wp in packed_ws:
        in_specs.append(pl.BlockSpec(wp.shape, lambda g: (0, 0)))
        operands.append(wp)
    in_specs += [pl.BlockSpec(scale.shape, lambda g: (0, 0)),
                 pl.BlockSpec(shift.shape, lambda g: (0, 0))]
    operands += [scale, shift]

    flops = 2 * n_pad * L * sum(co * ci * k
                                for (ci, co, k, _, _, _) in layer_cfgs)
    bytes_accessed = int(xf.size * 4
                         + sum(int(w.size) * 4 for w in packed_ws)
                         + (int(scale.size) + int(shift.size)) * 4
                         + G * hd * BL * 4)

    out_f = pl.pallas_call(
        kernel,
        out_shape=jax.ShapeDtypeStruct((G, hd, BL), jnp.float32),
        grid=(G,),
        in_specs=in_specs,
        out_specs=pl.BlockSpec((1, hd, BL), lambda g: (g, 0, 0)),
        scratch_shapes=[pltpu.VMEM((kc_max + 8, BL), jnp.float32)],   # im2col
        compiler_params=pltpu.CompilerParams(
            dimension_semantics=("parallel",)),   # batch axis -> both TCs (v7x)
        cost_estimate=pl.CostEstimate(flops=flops, transcendentals=0,
                                      bytes_accessed=bytes_accessed),
    )(*operands)

    out = (out_f.reshape(G, hd, b_tile, L)
                .transpose(0, 2, 1, 3)
                .reshape(n_pad, hd, L))
    return out[:N]


# --------------------------- parameter init / reference ----------------------

def init_params(key, hd):
    chans = [1, hd // 16, hd // 8, hd // 4, hd // 2, hd]
    ksizes = [3, 3, 5, 5, 7]
    conv_params = []
    for cin, cout, k in zip(chans[:-1], chans[1:], ksizes):
        key, kw, kb = jax.random.split(key, 3)
        bound = 1.0 / float(np.sqrt(cin * k))   # PyTorch Conv1d default U(-b, b)
        w = jax.random.uniform(kw, (cout, cin, k), jnp.float32, -bound, bound)
        b = jax.random.uniform(kb, (cout,), jnp.float32, -bound, bound)
        conv_params.append((w, b, (k - 1) // 2))
    key, kg, kb2, km, kv = jax.random.split(key, 5)
    gamma = jax.random.uniform(kg, (hd,), jnp.float32, 0.5, 1.5)
    beta = jax.random.uniform(kb2, (hd,), jnp.float32, -0.5, 0.5)
    rmean = jax.random.uniform(km, (hd,), jnp.float32, -0.1, 0.1)
    rvar = jax.random.uniform(kv, (hd,), jnp.float32, 0.5, 1.5)
    return conv_params, (gamma, beta, rmean, rvar)


def reference_forward(x, conv_params, bn_params, eps=1e-5):
    """Pure-JAX reference (matches PyTorch eval-mode forward)."""
    h = x
    for (w, b, pad) in conv_params:
        h = lax.conv_general_dilated(
            h, w, window_strides=(1,), padding=[(pad, pad)],
            dimension_numbers=("NCH", "OIH", "NCH"))
        h = h + b[None, :, None]
        h = jnp.where(h > 0, h, 0.01 * h)
    gamma, beta, rmean, rvar = bn_params
    inv = gamma / jnp.sqrt(rvar + eps)
    return h * inv[None, :, None] + (beta - rmean * inv)[None, :, None]


# ------------------------------------ main -----------------------------------

if __name__ == "__main__":
    hd = 32          # channel progression 1 -> 2 -> 4 -> 8 -> 16 -> 32
    N, L = 8, 128    # batch, sequence length (L on the 128-lane axis)
    B_TILE = 4       # 4 samples per step -> 512-lane RHS; 2 "parallel" steps

    key = jax.random.PRNGKey(0)
    key, kx = jax.random.split(key)
    x = jax.random.normal(kx, (N, 1, L), jnp.float32)

    conv_params, bn_params = init_params(key, hd)
    layer_cfgs, packed_ws, scale, shift = prepare_params(conv_params, bn_params)

    # TODO(synk): Dropout(0.5) is stochastic in training mode; eval-mode
    # (identity) is implemented here.  BatchNorm likewise uses running-stat
    # (eval) semantics rather than per-batch statistics.
    out = jax.block_until_ready(
        cnn_module_forward(x, layer_cfgs, packed_ws, scale, shift,
                           b_tile=B_TILE))
    assert out.shape == (N, hd, L), out.shape

    ref = reference_forward(x, conv_params, bn_params)
    np.testing.assert_allclose(np.asarray(out), np.asarray(ref),
                               rtol=1e-4, atol=1e-4)
    print("KERNEL_OK")
</pallas_src>

<mosaic_0001>
module attributes {stable_mosaic.version = 11 : i64} {
  func.func @kernel(%arg0: i32, %arg1: memref<1x8x512xf32, #tpu.memory_space<vmem>>, %arg2: memref<8x32xf32, #tpu.memory_space<vmem>>, %arg3: memref<8x32xf32, #tpu.memory_space<vmem>>, %arg4: memref<8x48xf32, #tpu.memory_space<vmem>>, %arg5: memref<16x48xf32, #tpu.memory_space<vmem>>, %arg6: memref<32x120xf32, #tpu.memory_space<vmem>>, %arg7: memref<32x1xf32, #tpu.memory_space<vmem>>, %arg8: memref<32x1xf32, #tpu.memory_space<vmem>>, %arg9: memref<1x32x512xf32, #tpu.memory_space<vmem>>, %arg10: memref<120x512xf32, #tpu.memory_space<vmem>>) attributes {dimension_semantics = [#tpu.dimension_semantics<parallel>], iteration_bounds = array<i64: 2>, scalar_prefetch = 0 : i64, scratch_operands = 1 : i64, tpu.core_type = #tpu.core_type<tc>, window_params = [{transform_indices = @transform_0, window_bounds = array<i64: 1, 8, 512>}, {pipeline_mode = #tpu.pipeline_mode<synchronous>, transform_indices = @transform_1, window_bounds = array<i64: 8, 32>}, {pipeline_mode = #tpu.pipeline_mode<synchronous>, transform_indices = @transform_2, window_bounds = array<i64: 8, 32>}, {pipeline_mode = #tpu.pipeline_mode<synchronous>, transform_indices = @transform_3, window_bounds = array<i64: 8, 48>}, {pipeline_mode = #tpu.pipeline_mode<synchronous>, transform_indices = @transform_4, window_bounds = array<i64: 16, 48>}, {pipeline_mode = #tpu.pipeline_mode<synchronous>, transform_indices = @transform_5, window_bounds = array<i64: 32, 120>}, {pipeline_mode = #tpu.pipeline_mode<synchronous>, transform_indices = @transform_6, window_bounds = array<i64: 32, 1>}, {pipeline_mode = #tpu.pipeline_mode<synchronous>, transform_indices = @transform_7, window_bounds = array<i64: 32, 1>}, {transform_indices = @transform_8, window_bounds = array<i64: 1, 32, 512>}]} {
    %0 = tpu.iota {dimensions = array<i32: 1>} : vector<1x512xi32>
    %c128_i32 = arith.constant 128 : i32
    %c0_i32 = arith.constant 0 : i32
    %1 = arith.cmpi eq, %c128_i32, %c0_i32 : i32
    %c1_i32 = arith.constant 1 : i32
    %2 = arith.select %1, %c1_i32, %c128_i32 : i32
    %3 = vector.broadcast %2 : i32 to vector<1x512xi32>
    %4 = arith.remsi %0, %3 : vector<1x512xi32>
    %c0_i32_0 = arith.constant 0 : i32
    %5 = vector.broadcast %c0_i32_0 : i32 to vector<1x512xi32>
    %6 = arith.cmpi ne, %4, %5 : vector<1x512xi32>
    %c0_i32_1 = arith.constant 0 : i32
    %7 = vector.broadcast %c0_i32_1 : i32 to vector<1x512xi32>
    %8 = arith.cmpi slt, %4, %7 : vector<1x512xi32>
    %c0_i32_2 = arith.constant 0 : i32
    %9 = arith.cmpi slt, %2, %c0_i32_2 : i32
    %10 = vector.broadcast %9 : i1 to vector<1x512xi1>
    %11 = vector.broadcast %10 : vector<1x512xi1> to vector<1x512xi1>
    %12 = arith.xori %8, %11 : vector<1x512xi1>
    %13 = arith.andi %12, %6 : vector<1x512xi1>
    %14 = vector.broadcast %2 : i32 to vector<1x512xi32>
    %15 = arith.addi %4, %14 : vector<1x512xi32>
    %16 = arith.select %13, %15, %4 : vector<1x512xi1>, vector<1x512xi32>
    %cst = arith.constant 1.000000e+00 : f32
    %17 = vector.broadcast %cst : f32 to vector<8x512xf32>
    %c0 = arith.constant 0 : index
    %c0_3 = arith.constant 0 : index
    %c0_4 = arith.constant 0 : index
    %18 = vector.load %arg1[%c0, %c0_3, %c0_4] : memref<1x8x512xf32, #tpu.memory_space<vmem>>, vector<1x8x512xf32>
    %19 = vector.shape_cast %18 : vector<1x8x512xf32> to vector<8x512xf32>
    %c1_i32_5 = arith.constant 1 : i32
    %20 = tpu.dynamic_rotate %19 by %c1_i32_5 dim 1 : vector<8x512xf32>, i32 -> vector<8x512xf32>
    %c1_i32_6 = arith.constant 1 : i32
    %21 = vector.broadcast %c1_i32_6 : i32 to vector<1x512xi32>
    %22 = arith.cmpi sge, %16, %21 : vector<1x512xi32>
    %23 = arith.extui %22 : vector<1x512xi1> to vector<1x512xi32>
    %24 = arith.sitofp %23 : vector<1x512xi32> to vector<1x512xf32>
    %25 = vector.broadcast %24 : vector<1x512xf32> to vector<8x512xf32>
    %26 = arith.mulf %20, %25 : vector<8x512xf32>
    %c0_7 = arith.constant 0 : index
    %c0_8 = arith.constant 0 : index
    %27 = vector.load %arg10[%c0_7, %c0_8] : memref<120x512xf32, #tpu.memory_space<vmem>>, vector<8x512xf32>
    tpu.vector_store %arg10[%c0_7, %c0_8], %26 {strides = array<i32>} : memref<120x512xf32, #tpu.memory_space<vmem>>, vector<8x512xf32>,
    %c8 = arith.constant 8 : index
    %c0_9 = arith.constant 0 : index
    %28 = vector.load %arg10[%c8, %c0_9] : memref<120x512xf32, #tpu.memory_space<vmem>>, vector<8x512xf32>
    tpu.vector_store %arg10[%c8, %c0_9], %19 {strides = array<i32>} : memref<120x512xf32, #tpu.memory_space<vmem>>, vector<8x512xf32>,
    %c511_i32 = arith.constant 511 : i32
    %29 = tpu.dynamic_rotate %19 by %c511_i32 dim 1 : vector<8x512xf32>, i32 -> vector<8x512xf32>
    %c127_i32 = arith.constant 127 : i32
    %30 = vector.broadcast %c127_i32 : i32 to vector<1x512xi32>
    %31 = arith.cmpi slt, %16, %30 : vector<1x512xi32>
    %32 = arith.extui %31 : vector<1x512xi1> to vector<1x512xi32>
    %33 = arith.sitofp %32 : vector<1x512xi32> to vector<1x512xf32>
    %34 = vector.broadcast %33 : vector<1x512xf32> to vector<8x512xf32>
    %35 = arith.mulf %29, %34 : vector<8x512xf32>
    %c16 = arith.constant 16 : index
    %c0_10 = arith.constant 0 : index
    %36 = vector.load %arg10[%c16, %c0_10] : memref<120x512xf32, #tpu.memory_space<vmem>>, vector<8x512xf32>
    tpu.vector_store %arg10[%c16, %c0_10], %35 {strides = array<i32>} : memref<120x512xf32, #tpu.memory_space<vmem>>, vector<8x512xf32>,
    %c24 = arith.constant 24 : index
    %c0_11 = arith.constant 0 : index
    %37 = vector.load %arg10[%c24, %c0_11] : memref<120x512xf32, #tpu.memory_space<vmem>>, vector<8x512xf32>
    tpu.vector_store %arg10[%c24, %c0_11], %17 {strides = array<i32>} : memref<120x512xf32, #tpu.memory_space<vmem>>, vector<8x512xf32>,
    %c0_12 = arith.constant 0 : index
    %c0_13 = arith.constant 0 : index
    %38 = vector.load %arg2[%c0_12, %c0_13] : memref<8x32xf32, #tpu.memory_space<vmem>>, vector<8x32xf32>
    %c0_14 = arith.constant 0 : index
    %c0_15 = arith.constant 0 : index
    %39 = vector.load %arg10[%c0_14, %c0_15] : memref<120x512xf32, #tpu.memory_space<vmem>>, vector<32x512xf32>
    %cst_16 = arith.constant dense<0.000000e+00> : vector<8x512xf32>
    %40 = tpu.matmul %38, %39, %cst_16 {dimension_numbers = #tpu.dot_dimension_numbers<[1], [0], [0], [1], [0, 0, 1, 1], [], []>} : vector<8x32xf32>, vector<32x512xf32>, vector<8x512xf32> -> vector<8x512xf32>
    %cst_17 = arith.constant 0.000000e+00 : f32
    %41 = vector.broadcast %cst_17 : f32 to vector<8x512xf32>
    %42 = arith.cmpf ogt, %40, %41 : vector<8x512xf32>
    %cst_18 = arith.constant 0.00999999977 : f32
    %43 = vector.broadcast %cst_18 : f32 to vector<8x512xf32>
    %44 = arith.mulf %43, %40 : vector<8x512xf32>
    %45 = arith.select %42, %40, %44 : vector<8x512xi1>, vector<8x512xf32>
    %c1_i32_19 = arith.constant 1 : i32
    %46 = tpu.dynamic_rotate %45 by %c1_i32_19 dim 1 : vector<8x512xf32>, i32 -> vector<8x512xf32>
    %47 = vector.broadcast %24 : vector<1x512xf32> to vector<8x512xf32>
    %48 = arith.mulf %46, %47 : vector<8x512xf32>
    %c0_20 = arith.constant 0 : index
    %c0_21 = arith.constant 0 : index
    %49 = vector.load %arg10[%c0_20, %c0_21] : memref<120x512xf32, #tpu.memory_space<vmem>>, vector<8x512xf32>
    tpu.vector_store %arg10[%c0_20, %c0_21], %48 {strides = array<i32>} : memref<120x512xf32, #tpu.memory_space<vmem>>, vector<8x512xf32>,
    %c8_22 = arith.constant 8 : index
    %c0_23 = arith.constant 0 : index
    %50 = vector.load %arg10[%c8_22, %c0_23] : memref<120x512xf32, #tpu.memory_space<vmem>>, vector<8x512xf32>
    tpu.vector_store %arg10[%c8_22, %c0_23], %45 {strides = array<i32>} : memref<120x512xf32, #tpu.memory_space<vmem>>, vector<8x512xf32>,
    %c511_i32_24 = arith.constant 511 : i32
    %51 = tpu.dynamic_rotate %45 by %c511_i32_24 dim 1 : vector<8x512xf32>, i32 -> vector<8x512xf32>
    %52 = vector.broadcast %33 : vector<1x512xf32> to vector<8x512xf32>
    %53 = arith.mulf %51, %52 : vector<8x512xf32>
    %c16_25 = arith.constant 16 : index
    %c0_26 = arith.constant 0 : index
    %54 = vector.load %arg10[%c16_25, %c0_26] : memref<120x512xf32, #tpu.memory_space<vmem>>, vector<8x512xf32>
    tpu.vector_store %arg10[%c16_25, %c0_26], %53 {strides = array<i32>} : memref<120x512xf32, #tpu.memory_space<vmem>>, vector<8x512xf32>,
    %c24_27 = arith.constant 24 : index
    %c0_28 = arith.constant 0 : index
    %55 = vector.load %arg10[%c24_27, %c0_28] : memref<120x512xf32, #tpu.memory_space<vmem>>, vector<8x512xf32>
    tpu.vector_store %arg10[%c24_27, %c0_28], %17 {strides = array<i32>} : memref<120x512xf32, #tpu.memory_space<vmem>>, vector<8x512xf32>,
    %c0_29 = arith.constant 0 : index
    %c0_30 = arith.constant 0 : index
    %56 = vector.load %arg3[%c0_29, %c0_30] : memref<8x32xf32, #tpu.memory_space<vmem>>, vector<8x32xf32>
    %c0_31 = arith.constant 0 : index
    %c0_32 = arith.constant 0 : index
    %57 = vector.load %arg10[%c0_31, %c0_32] : memref<120x512xf32, #tpu.memory_space<vmem>>, vector<32x512xf32>
    %cst_33 = arith.constant dense<0.000000e+00> : vector<8x512xf32>
    %58 = tpu.matmul %56, %57, %cst_33 {dimension_numbers = #tpu.dot_dimension_numbers<[1], [0], [0], [1], [0, 0, 1, 1], [], []>} : vector<8x32xf32>, vector<32x512xf32>, vector<8x512xf32> -> vector<8x512xf32>
    %cst_34 = arith.constant 0.000000e+00 : f32
    %59 = vector.broadcast %cst_34 : f32 to vector<8x512xf32>
    %60 = arith.cmpf ogt, %58, %59 : vector<8x512xf32>
    %cst_35 = arith.constant 0.00999999977 : f32
    %61 = vector.broadcast %cst_35 : f32 to vector<8x512xf32>
    %62 = arith.mulf %61, %58 : vector<8x512xf32>
    %63 = arith.select %60, %58, %62 : vector<8x512xi1>, vector<8x512xf32>
    %c2_i32 = arith.constant 2 : i32
    %64 = tpu.dynamic_rotate %63 by %c2_i32 dim 1 : vector<8x512xf32>, i32 -> vector<8x512xf32>
    %c2_i32_36 = arith.constant 2 : i32
    %65 = vector.broadcast %c2_i32_36 : i32 to vector<1x512xi32>
    %66 = arith.cmpi sge, %16, %65 : vector<1x512xi32>
    %67 = arith.extui %66 : vector<1x512xi1> to vector<1x512xi32>
    %68 = arith.sitofp %67 : vector<1x512xi32> to vector<1x512xf32>
    %69 = vector.broadcast %68 : vector<1x512xf32> to vector<8x512xf32>
    %70 = arith.mulf %64, %69 : vector<8x512xf32>
    %c0_37 = arith.constant 0 : index
    %c0_38 = arith.constant 0 : index
    %71 = vector.load %arg10[%c0_37, %c0_38] : memref<120x512xf32, #tpu.memory_space<vmem>>, vector<8x512xf32>
    tpu.vector_store %arg10[%c0_37, %c0_38], %70 {strides = array<i32>} : memref<120x512xf32, #tpu.memory_space<vmem>>, vector<8x512xf32>,
    %c1_i32_39 = arith.constant 1 : i32
    %72 = tpu.dynamic_rotate %63 by %c1_i32_39 dim 1 : vector<8x512xf32>, i32 -> vector<8x512xf32>
    %73 = vector.broadcast %24 : vector<1x512xf32> to vector<8x512xf32>
    %74 = arith.mulf %72, %73 : vector<8x512xf32>
    %c8_40 = arith.constant 8 : index
    %c0_41 = arith.constant 0 : index
    %75 = vector.load %arg10[%c8_40, %c0_41] : memref<120x512xf32, #tpu.memory_space<vmem>>, vector<8x512xf32>
    tpu.vector_store %arg10[%c8_40, %c0_41], %74 {strides = array<i32>} : memref<120x512xf32, #tpu.memory_space<vmem>>, vector<8x512xf32>,
    %c16_42 = arith.constant 16 : index
    %c0_43 = arith.constant 0 : index
    %76 = vector.load %arg10[%c16_42, %c0_43] : memref<120x512xf32, #tpu.memory_space<vmem>>, vector<8x512xf32>
    tpu.vector_store %arg10[%c16_42, %c0_43], %63 {strides = array<i32>} : memref<120x512xf32, #tpu.memory_space<vmem>>, vector<8x512xf32>,
    %c511_i32_44 = arith.constant 511 : i32
    %77 = tpu.dynamic_rotate %63 by %c511_i32_44 dim 1 : vector<8x512xf32>, i32 -> vector<8x512xf32>
    %78 = vector.broadcast %33 : vector<1x512xf32> to vector<8x512xf32>
    %79 = arith.mulf %77, %78 : vector<8x512xf32>
    %c24_45 = arith.constant 24 : index
    %c0_46 = arith.constant 0 : index
    %80 = vector.load %arg10[%c24_45, %c0_46] : memref<120x512xf32, #tpu.memory_space<vmem>>, vector<8x512xf32>
    tpu.vector_store %arg10[%c24_45, %c0_46], %79 {strides = array<i32>} : memref<120x512xf32, #tpu.memory_space<vmem>>, vector<8x512xf32>,
    %c510_i32 = arith.constant 510 : i32
    %81 = tpu.dynamic_rotate %63 by %c510_i32 dim 1 : vector<8x512xf32>, i32 -> vector<8x512xf32>
    %c126_i32 = arith.constant 126 : i32
    %82 = vector.broadcast %c126_i32 : i32 to vector<1x512xi32>
    %83 = arith.cmpi slt, %16, %82 : vector<1x512xi32>
    %84 = arith.extui %83 : vector<1x512xi1> to vector<1x512xi32>
    %85 = arith.sitofp %84 : vector<1x512xi32> to vector<1x512xf32>
    %86 = vector.broadcast %85 : vector<1x512xf32> to vector<8x512xf32>
    %87 = arith.mulf %81, %86 : vector<8x512xf32>
    %c32 = arith.constant 32 : index
    %c0_47 = arith.constant 0 : index
    %88 = vector.load %arg10[%c32, %c0_47] : memref<120x512xf32, #tpu.memory_space<vmem>>, vector<8x512xf32>
    tpu.vector_store %arg10[%c32, %c0_47], %87 {strides = array<i32>} : memref<120x512xf32, #tpu.memory_space<vmem>>, vector<8x512xf32>,
    %c40 = arith.constant 40 : index
    %c0_48 = arith.constant 0 : index
    %89 = vector.load %arg10[%c40, %c0_48] : memref<120x512xf32, #tpu.memory_space<vmem>>, vector<8x512xf32>
    tpu.vector_store %arg10[%c40, %c0_48], %17 {strides = array<i32>} : memref<120x512xf32, #tpu.memory_space<vmem>>, vector<8x512xf32>,
    %c0_49 = arith.constant 0 : index
    %c0_50 = arith.constant 0 : index
    %90 = vector.load %arg4[%c0_49, %c0_50] : memref<8x48xf32, #tpu.memory_space<vmem>>, vector<8x48xf32>
    %c0_51 = arith.constant 0 : index
    %c0_52 = arith.constant 0 : index
    %91 = vector.load %arg10[%c0_51, %c0_52] : memref<120x512xf32, #tpu.memory_space<vmem>>, vector<48x512xf32>
    %cst_53 = arith.constant dense<0.000000e+00> : vector<8x512xf32>
    %92 = tpu.matmul %90, %91, %cst_53 {dimension_numbers = #tpu.dot_dimension_numbers<[1], [0], [0], [1], [0, 0, 1, 1], [], []>} : vector<8x48xf32>, vector<48x512xf32>, vector<8x512xf32> -> vector<8x512xf32>
    %cst_54 = arith.constant 0.000000e+00 : f32
    %93 = vector.broadcast %cst_54 : f32 to vector<8x512xf32>
    %94 = arith.cmpf ogt, %92, %93 : vector<8x512xf32>
    %cst_55 = arith.constant 0.00999999977 : f32
    %95 = vector.broadcast %cst_55 : f32 to vector<8x512xf32>
    %96 = arith.mulf %95, %92 : vector<8x512xf32>
    %97 = arith.select %94, %92, %96 : vector<8x512xi1>, vector<8x512xf32>
    %c2_i32_56 = arith.constant 2 : i32
    %98 = tpu.dynamic_rotate %97 by %c2_i32_56 dim 1 : vector<8x512xf32>, i32 -> vector<8x512xf32>
    %99 = vector.broadcast %68 : vector<1x512xf32> to vector<8x512xf32>
    %100 = arith.mulf %98, %99 : vector<8x512xf32>
    %c0_57 = arith.constant 0 : index
    %c0_58 = arith.constant 0 : index
    %101 = vector.load %arg10[%c0_57, %c0_58] : memref<120x512xf32, #tpu.memory_space<vmem>>, vector<8x512xf32>
    tpu.vector_store %arg10[%c0_57, %c0_58], %100 {strides = array<i32>} : memref<120x512xf32, #tpu.memory_space<vmem>>, vector<8x512xf32>,
    %c1_i32_59 = arith.constant 1 : i32
    %102 = tpu.dynamic_rotate %97 by %c1_i32_59 dim 1 : vector<8x512xf32>, i32 -> vector<8x512xf32>
    %103 = vector.broadcast %24 : vector<1x512xf32> to vector<8x512xf32>
    %104 = arith.mulf %102, %103 : vector<8x512xf32>
    %c8_60 = arith.constant 8 : index
    %c0_61 = arith.constant 0 : index
    %105 = vector.load %arg10[%c8_60, %c0_61] : memref<120x512xf32, #tpu.memory_space<vmem>>, vector<8x512xf32>
    tpu.vector_store %arg10[%c8_60, %c0_61], %104 {strides = array<i32>} : memref<120x512xf32, #tpu.memory_space<vmem>>, vector<8x512xf32>,
    %c16_62 = arith.constant 16 : index
    %c0_63 = arith.constant 0 : index
    %106 = vector.load %arg10[%c16_62, %c0_63] : memref<120x512xf32, #tpu.memory_space<vmem>>, vector<8x512xf32>
    tpu.vector_store %arg10[%c16_62, %c0_63], %97 {strides = array<i32>} : memref<120x512xf32, #tpu.memory_space<vmem>>, vector<8x512xf32>,
    %c511_i32_64 = arith.constant 511 : i32
    %107 = tpu.dynamic_rotate %97 by %c511_i32_64 dim 1 : vector<8x512xf32>, i32 -> vector<8x512xf32>
    %108 = vector.broadcast %33 : vector<1x512xf32> to vector<8x512xf32>
    %109 = arith.mulf %107, %108 : vector<8x512xf32>
    %c24_65 = arith.constant 24 : index
    %c0_66 = arith.constant 0 : index
    %110 = vector.load %arg10[%c24_65, %c0_66] : memref<120x512xf32, #tpu.memory_space<vmem>>, vector<8x512xf32>
    tpu.vector_store %arg10[%c24_65, %c0_66], %109 {strides = array<i32>} : memref<120x512xf32, #tpu.memory_space<vmem>>, vector<8x512xf32>,
    %c510_i32_67 = arith.constant 510 : i32
    %111 = tpu.dynamic_rotate %97 by %c510_i32_67 dim 1 : vector<8x512xf32>, i32 -> vector<8x512xf32>
    %112 = vector.broadcast %85 : vector<1x512xf32> to vector<8x512xf32>
    %113 = arith.mulf %111, %112 : vector<8x512xf32>
    %c32_68 = arith.constant 32 : index
    %c0_69 = arith.constant 0 : index
    %114 = vector.load %arg10[%c32_68, %c0_69] : memref<120x512xf32, #tpu.memory_space<vmem>>, vector<8x512xf32>
    tpu.vector_store %arg10[%c32_68, %c0_69], %113 {strides = array<i32>} : memref<120x512xf32, #tpu.memory_space<vmem>>, vector<8x512xf32>,
    %c40_70 = arith.constant 40 : index
    %c0_71 = arith.constant 0 : index
    %115 = vector.load %arg10[%c40_70, %c0_71] : memref<120x512xf32, #tpu.memory_space<vmem>>, vector<8x512xf32>
    tpu.vector_store %arg10[%c40_70, %c0_71], %17 {strides = array<i32>} : memref<120x512xf32, #tpu.memory_space<vmem>>, vector<8x512xf32>,
    %c0_72 = arith.constant 0 : index
    %c0_73 = arith.constant 0 : index
    %116 = vector.load %arg5[%c0_72, %c0_73] : memref<16x48xf32, #tpu.memory_space<vmem>>, vector<16x48xf32>
    %c0_74 = arith.constant 0 : index
    %c0_75 = arith.constant 0 : index
    %117 = vector.load %arg10[%c0_74, %c0_75] : memref<120x512xf32, #tpu.memory_space<vmem>>, vector<48x512xf32>
    %cst_76 = arith.constant dense<0.000000e+00> : vector<16x512xf32>
    %118 = tpu.matmul %116, %117, %cst_76 {dimension_numbers = #tpu.dot_dimension_numbers<[1], [0], [0], [1], [0, 0, 1, 1], [], []>} : vector<16x48xf32>, vector<48x512xf32>, vector<16x512xf32> -> vector<16x512xf32>
    %cst_77 = arith.constant 0.000000e+00 : f32
    %119 = vector.broadcast %cst_77 : f32 to vector<16x512xf32>
    %120 = arith.cmpf ogt, %118, %119 : vector<16x512xf32>
    %cst_78 = arith.constant 0.00999999977 : f32
    %121 = vector.broadcast %cst_78 : f32 to vector<16x512xf32>
    %122 = arith.mulf %121, %118 : vector<16x512xf32>
    %123 = arith.select %120, %118, %122 : vector<16x512xi1>, vector<16x512xf32>
    %c3_i32 = arith.constant 3 : i32
    %124 = tpu.dynamic_rotate %123 by %c3_i32 dim 1 : vector<16x512xf32>, i32 -> vector<16x512xf32>
    %c3_i32_79 = arith.constant 3 : i32
    %125 = vector.broadcast %c3_i32_79 : i32 to vector<1x512xi32>
    %126 = arith.cmpi sge, %16, %125 : vector<1x512xi32>
    %127 = arith.extui %126 : vector<1x512xi1> to vector<1x512xi32>
    %128 = arith.sitofp %127 : vector<1x512xi32> to vector<1x512xf32>
    %129 = vector.broadcast %128 : vector<1x512xf32> to vector<16x512xf32>
    %130 = arith.mulf %124, %129 : vector<16x512xf32>
    %c0_80 = arith.constant 0 : index
    %c0_81 = arith.constant 0 : index
    %131 = vector.load %arg10[%c0_80, %c0_81] : memref<120x512xf32, #tpu.memory_space<vmem>>, vector<16x512xf32>
    tpu.vector_store %arg10[%c0_80, %c0_81], %130 {strides = array<i32>} : memref<120x512xf32, #tpu.memory_space<vmem>>, vector<16x512xf32>,
    %c2_i32_82 = arith.constant 2 : i32
    %132 = tpu.dynamic_rotate %123 by %c2_i32_82 dim 1 : vector<16x512xf32>, i32 -> vector<16x512xf32>
    %133 = vector.broadcast %68 : vector<1x512xf32> to vector<16x512xf32>
    %134 = arith.mulf %132, %133 : vector<16x512xf32>
    %c16_83 = arith.constant 16 : index
    %c0_84 = arith.constant 0 : index
    %135 = vector.load %arg10[%c16_83, %c0_84] : memref<120x512xf32, #tpu.memory_space<vmem>>, vector<16x512xf32>
    tpu.vector_store %arg10[%c16_83, %c0_84], %134 {strides = array<i32>} : memref<120x512xf32, #tpu.memory_space<vmem>>, vector<16x512xf32>,
    %c1_i32_85 = arith.constant 1 : i32
    %136 = tpu.dynamic_rotate %123 by %c1_i32_85 dim 1 : vector<16x512xf32>, i32 -> vector<16x512xf32>
    %137 = vector.broadcast %24 : vector<1x512xf32> to vector<16x512xf32>
    %138 = arith.mulf %136, %137 : vector<16x512xf32>
    %c32_86 = arith.constant 32 : index
    %c0_87 = arith.constant 0 : index
    %139 = vector.load %arg10[%c32_86, %c0_87] : memref<120x512xf32, #tpu.memory_space<vmem>>, vector<16x512xf32>
    tpu.vector_store %arg10[%c32_86, %c0_87], %138 {strides = array<i32>} : memref<120x512xf32, #tpu.memory_space<vmem>>, vector<16x512xf32>,
    %c48 = arith.constant 48 : index
    %c0_88 = arith.constant 0 : index
    %140 = vector.load %arg10[%c48, %c0_88] : memref<120x512xf32, #tpu.memory_space<vmem>>, vector<16x512xf32>
    tpu.vector_store %arg10[%c48, %c0_88], %123 {strides = array<i32>} : memref<120x512xf32, #tpu.memory_space<vmem>>, vector<16x512xf32>,
    %c511_i32_89 = arith.constant 511 : i32
    %141 = tpu.dynamic_rotate %123 by %c511_i32_89 dim 1 : vector<16x512xf32>, i32 -> vector<16x512xf32>
    %142 = vector.broadcast %33 : vector<1x512xf32> to vector<16x512xf32>
    %143 = arith.mulf %141, %142 : vector<16x512xf32>
    %c64 = arith.constant 64 : index
    %c0_90 = arith.constant 0 : index
    %144 = vector.load %arg10[%c64, %c0_90] : memref<120x512xf32, #tpu.memory_space<vmem>>, vector<16x512xf32>
    tpu.vector_store %arg10[%c64, %c0_90], %143 {strides = array<i32>} : memref<120x512xf32, #tpu.memory_space<vmem>>, vector<16x512xf32>,
    %c510_i32_91 = arith.constant 510 : i32
    %145 = tpu.dynamic_rotate %123 by %c510_i32_91 dim 1 : vector<16x512xf32>, i32 -> vector<16x512xf32>
    %146 = vector.broadcast %85 : vector<1x512xf32> to vector<16x512xf32>
    %147 = arith.mulf %145, %146 : vector<16x512xf32>
    %c80 = arith.constant 80 : index
    %c0_92 = arith.constant 0 : index
    %148 = vector.load %arg10[%c80, %c0_92] : memref<120x512xf32, #tpu.memory_space<vmem>>, vector<16x512xf32>
    tpu.vector_store %arg10[%c80, %c0_92], %147 {strides = array<i32>} : memref<120x512xf32, #tpu.memory_space<vmem>>, vector<16x512xf32>,
    %c509_i32 = arith.constant 509 : i32
    %149 = tpu.dynamic_rotate %123 by %c509_i32 dim 1 : vector<16x512xf32>, i32 -> vector<16x512xf32>
    %c125_i32 = arith.constant 125 : i32
    %150 = vector.broadcast %c125_i32 : i32 to vector<1x512xi32>
    %151 = arith.cmpi slt, %16, %150 : vector<1x512xi32>
    %152 = arith.extui %151 : vector<1x512xi1> to vector<1x512xi32>
    %153 = arith.sitofp %152 : vector<1x512xi32> to vector<1x512xf32>
    %154 = vector.broadcast %153 : vector<1x512xf32> to vector<16x512xf32>
    %155 = arith.mulf %149, %154 : vector<16x512xf32>
    %c96 = arith.constant 96 : index
    %c0_93 = arith.constant 0 : index
    %156 = vector.load %arg10[%c96, %c0_93] : memref<120x512xf32, #tpu.memory_space<vmem>>, vector<16x512xf32>
    tpu.vector_store %arg10[%c96, %c0_93], %155 {strides = array<i32>} : memref<120x512xf32, #tpu.memory_space<vmem>>, vector<16x512xf32>,
    %c112 = arith.constant 112 : index
    %c0_94 = arith.constant 0 : index
    %157 = vector.load %arg10[%c112, %c0_94] : memref<120x512xf32, #tpu.memory_space<vmem>>, vector<8x512xf32>
    tpu.vector_store %arg10[%c112, %c0_94], %17 {strides = array<i32>} : memref<120x512xf32, #tpu.memory_space<vmem>>, vector<8x512xf32>,
    %c0_95 = arith.constant 0 : index
    %c0_96 = arith.constant 0 : index
    %158 = vector.load %arg6[%c0_95, %c0_96] : memref<32x120xf32, #tpu.memory_space<vmem>>, vector<32x120xf32>
    %c0_97 = arith.constant 0 : index
    %c0_98 = arith.constant 0 : index
    %159 = vector.load %arg10[%c0_97, %c0_98] : memref<120x512xf32, #tpu.memory_space<vmem>>, vector<120x512xf32>
    %cst_99 = arith.constant dense<0.000000e+00> : vector<32x512xf32>
    %160 = tpu.matmul %158, %159, %cst_99 {dimension_numbers = #tpu.dot_dimension_numbers<[1], [0], [0], [1], [0, 0, 1, 1], [], []>} : vector<32x120xf32>, vector<120x512xf32>, vector<32x512xf32> -> vector<32x512xf32>
    %cst_100 = arith.constant 0.000000e+00 : f32
    %161 = vector.broadcast %cst_100 : f32 to vector<32x512xf32>
    %162 = arith.cmpf ogt, %160, %161 : vector<32x512xf32>
    %cst_101 = arith.constant 0.00999999977 : f32
    %163 = vector.broadcast %cst_101 : f32 to vector<32x512xf32>
    %164 = arith.mulf %163, %160 : vector<32x512xf32>
    %165 = arith.select %162, %160, %164 : vector<32x512xi1>, vector<32x512xf32>
    %c0_102 = arith.constant 0 : index
    %c0_103 = arith.constant 0 : index
    %166 = vector.load %arg7[%c0_102, %c0_103] : memref<32x1xf32, #tpu.memory_space<vmem>>, vector<32x1xf32>
    %167 = vector.broadcast %166 : vector<32x1xf32> to vector<32x512xf32>
    %168 = arith.mulf %165, %167 : vector<32x512xf32>
    %c0_104 = arith.constant 0 : index
    %c0_105 = arith.constant 0 : index
    %169 = vector.load %arg8[%c0_104, %c0_105] : memref<32x1xf32, #tpu.memory_space<vmem>>, vector<32x1xf32>
    %170 = vector.broadcast %169 : vector<32x1xf32> to vector<32x512xf32>
    %171 = arith.addf %168, %170 : vector<32x512xf32>
    %c0_106 = arith.constant 0 : index
    %c0_107 = arith.constant 0 : index
    %c0_108 = arith.constant 0 : index
    %172 = vector.load %arg9[%c0_106, %c0_107, %c0_108] : memref<1x32x512xf32, #tpu.memory_space<vmem>>, vector<1x32x512xf32>
    %173 = vector.shape_cast %172 : vector<1x32x512xf32> to vector<32x512xf32>
    %174 = vector.shape_cast %171 : vector<32x512xf32> to vector<1x32x512xf32>
    tpu.vector_store %arg9[%c0_106, %c0_107, %c0_108], %174 {strides = array<i32>} : memref<1x32x512xf32, #tpu.memory_space<vmem>>, vector<1x32x512xf32>,
    return
  }
  func.func @transform_0(%arg0: i32) -> (i32, i32, i32) {
    %c0_i32 = arith.constant 0 : i32
    %c0_i32_0 = arith.constant 0 : i32
    %c0_i32_1 = arith.constant 0 : i32
    return %arg0, %c0_i32, %c0_i32_0 : i32, i32, i32
  }
  func.func @transform_1(%arg0: i32) -> (i32, i32) {
    %c0_i32 = arith.constant 0 : i32
    %c0_i32_0 = arith.constant 0 : i32
    %c0_i32_1 = arith.constant 0 : i32
    return %c0_i32, %c0_i32_0 : i32, i32
  }
  func.func @transform_2(%arg0: i32) -> (i32, i32) {
    %c0_i32 = arith.constant 0 : i32
    %c0_i32_0 = arith.constant 0 : i32
    %c0_i32_1 = arith.constant 0 : i32
    return %c0_i32, %c0_i32_0 : i32, i32
  }
  func.func @transform_3(%arg0: i32) -> (i32, i32) {
    %c0_i32 = arith.constant 0 : i32
    %c0_i32_0 = arith.constant 0 : i32
    %c0_i32_1 = arith.constant 0 : i32
    return %c0_i32, %c0_i32_0 : i32, i32
  }
  func.func @transform_4(%arg0: i32) -> (i32, i32) {
    %c0_i32 = arith.constant 0 : i32
    %c0_i32_0 = arith.constant 0 : i32
    %c0_i32_1 = arith.constant 0 : i32
    return %c0_i32, %c0_i32_0 : i32, i32
  }
  func.func @transform_5(%arg0: i32) -> (i32, i32) {
    %c0_i32 = arith.constant 0 : i32
    %c0_i32_0 = arith.constant 0 : i32
    %c0_i32_1 = arith.constant 0 : i32
    return %c0_i32, %c0_i32_0 : i32, i32
  }
  func.func @transform_6(%arg0: i32) -> (i32, i32) {
    %c0_i32 = arith.constant 0 : i32
    %c0_i32_0 = arith.constant 0 : i32
    %c0_i32_1 = arith.constant 0 : i32
    return %c0_i32, %c0_i32_0 : i32, i32
  }
  func.func @transform_7(%arg0: i32) -> (i32, i32) {
    %c0_i32 = arith.constant 0 : i32
    %c0_i32_0 = arith.constant 0 : i32
    %c0_i32_1 = arith.constant 0 : i32
    return %c0_i32, %c0_i32_0 : i32, i32
  }
  func.func @transform_8(%arg0: i32) -> (i32, i32, i32) {
    %c0_i32 = arith.constant 0 : i32
    %c0_i32_0 = arith.constant 0 : i32
    %c0_i32_1 = arith.constant 0 : i32
    return %arg0, %c0_i32, %c0_i32_0 : i32, i32, i32
  }
}

</mosaic_0001>

<bundles_post_ra>
// kernel: tpu_custom_call.1
= control target key start
LH: loop header
LB: loop body
LE: loop exit
PB: predicated region body
PF: predicated region fallthrough
CT: control target
= control target key end

     0   :  { %13 = vsyncpa [#allocation4], 0  ;;  %s3853_s0 = inlined_call_operand.vmem [shape: f32[2,8,512], index: 0, kind: input, shape index: {}]   ;;  %s3854_s1 = inlined_call_operand.hbm [shape: f32[8,32], index: 1, kind: input, shape index: {}]   ;;  %s3855_s2 = inlined_call_operand.hbm [shape: f32[8,32], index: 2, kind: input, shape index: {}]   ;;  %s3856_s3 = inlined_call_operand.hbm [shape: f32[8,48], index: 3, kind: input, shape index: {}]   ;;  %s3857_s4 = inlined_call_operand.vmem [shape: f32[16,48], index: 4, kind: input, shape index: {}]   ;;  %s3858_s5 = inlined_call_operand.hbm [shape: f32[32,120], index: 5, kind: input, shape index: {}]   ;;  %s3859_s6 = inlined_call_operand.vmem [shape: f32[32,1], index: 6, kind: input, shape index: {}]   ;;  %s3860_s7 = inlined_call_operand.vmem [shape: f32[32,1], index: 7, kind: input, shape index: {}]   ;;  %s3861_s8 = inlined_call_operand.hbm [shape: f32[2,32,512], index: 8, kind: output, shape index: {}]  }
   0x1   :  { %14 = vsyncpa [#allocation7], 0 }
   0x2   :  { %15 = vsyncpa [#allocation10], 0 }
   0x3   :  { %16 = vsyncpa [#allocation5], 0 }
   0x4   :  { %18 = vsyncpa [#allocation5 + $0x1], 0  ;;  %s2820_s27 = smov 0   ;;  %s2822_s28 = smov 0  }
   0x5   :  { %s2824_s29 = smov 0   ;;  %s2826_s30 = smov 0  }
   0x6 LB: > { %3883 = sst [smem:[#allocation16_spill]] %s2751_s29  ;;  %s2841_s9 = sadd.s32 4294967295, %s2755_s30   ;;  %s2755_s30 = sphi %s2826_s30, %s3927_s30   ;;  %s2751_s29 = sphi %s2824_s29, %s3924_s29   ;;  %s2747_s28 = sphi %s2822_s28, %s3926_s28   ;;  %s2743_s27 = sphi %s2820_s27, %s3925_s27  }
   0x7   : > { %s2274_s10 = sadd.s32 4294967294, %s2755_s30   ;;  %s2845_s11 = sadd.s32 1, %s2755_s30  }
   0x8   : > { %s204_s12 = sadd.s32 1, %s2751_s29  ;;  %s201_s13 = ssub.s32 %s2755_s30, %s2845_s11 }
   0x9   : > { %p214_p0 = scmp.ne.s32.totalorder %s2751_s29, %s2747_s28  ;;  %p202_p1 = scmp.eq.s32.totalorder %s201_s13, 0 }
   0xa   : > { %p215_p2 = scmp.eq.s32.totalorder %s2841_s9, 1  ;;  %p220_p3 = scmp.ne.s32.totalorder %s2747_s28, %s2743_s27 }
   0xb   : > { %p221_p4 = scmp.eq.s32.totalorder %s2274_s10, 1  ;;  %p2275_p7 = scmp.ge.s32.totalorder %s2755_s30, 1 }
   0xc   : > { %s2856_s14 = scalar_select %p202_p1, %s2751_s29, %s204_s12  }
   0xd   : > { %p2858_p5 = por %p215_p2, %p214_p0  ;;  %p2862_p6 = por %p221_p4, %p220_p3 }
   0xe   : > { %3884 = sst [smem:[#allocation17_spill]] %s2856_s14  ;;  %p228_p8 = scmp.lt.s32.totalorder %s2755_s30, 3 }
   0xf   : > { %s3885_s15 = scalar_select %p2858_p5, 1, 0 }
  0x10   : > { %s3886_s16 = scalar_select %p2862_p6, 1, 0 }
  0x11   : > { %p3862_p9 = scmp.eq.s32.totalorder %s2841_s9, 0  ;;  %p2869_p10 = pnand %p2275_p7, %p228_p8 }
  0x12   : > { %s2757_s18 = smov [#allocation6]   ;;  %s2758_s20 = smov [#allocation3]  }
  0x13   : > { %s3887_s17 = scalar_select %p2869_p10, 1, 0 }
  0x14   : > { %s252_s19 = sshll.u32 %s2757_s18, 4  ;;  %p2492_p11 = pneg %p2869_p10  ;;  %s253_s19 = int_to_ptr.vmem [resolvable:$true] %s252_s19 }
  0x15   : > { %s241_s21 = sshll.u32 %s2758_s20, 4  ;;  %s2759_s23 = smov [#allocation8]   ;;  %s2881_s21 = int_to_ptr.vmem [resolvable:$true] %s241_s21 }
  0x16   : > { %p2877_p12 = pnand %p3862_p9, %p2492_p11  ;;  %s263_s24 = sshll.u32 %s2759_s23, 4  ;;  %s2883_s24 = int_to_ptr.vmem [resolvable:$true] %s263_s24 }
  0x17   : > { %s2569_s10 = scalar_lea.hbm %s3855_s2, 128 }
  0x18   : > { %p2570_p13 = scmp.ne.s32.totalorder %s3855_s2, %s2569_s10  ;;  %p2893_p0 = pneg %p2877_p12 }
  0x19   : > { %p2576_p3 = scmp.lt.u32.totalorder %s2569_s10, %s3855_s2 }
  0x1a   : > { %p2572_p1 = pnand %p2893_p0, %p2570_p13 }
  0x1c   : > { %p2573_p2 = pneg %p2572_p1 }
  0x1e   : > { %p2578_p4 = pnand %p2576_p3, %p2573_p2 }
  0x20   : > { %2581 = shalt.err (!%p2578_p4)
}
  0x21   : > { %s2582_s25 = scalar_lea.vmem %s253_s19, 128  ;;  %p2590_p9 = scmp.lt.s32.totalorder %s253_s19, %s253_s19 }
  0x22   : > { %p2583_p7 = scmp.ne.s32.totalorder %s253_s19, %s2582_s25  ;;  %p2591_p6 = scmp.lt.s32.totalorder %s2582_s25, %s2582_s25 }
  0x24   : > { %p2585_p8 = pnand %p2583_p7, %p2893_p0  ;;  %p2592_p5 = por %p2591_p6, %p2590_p9 }
  0x26   : > { %p2586_p11 = pneg %p2585_p8 }
  0x28   : > { %p2593_p10 = pnand %p2592_p5, %p2586_p11 }
  0x2a   : > { %2596 = shalt.err (!%p2593_p10)
}
  0x2b   : > { %2498 = dma.hbm_to_vmem [thread:$0]  (!%p2877_p12), %s3855_s2, 128, %s253_s19, [#allocation7]  }
  0x2c   : > { %s2597_s20 = scalar_lea.hbm %s3854_s1, 128 }
  0x2d   : > { %p2598_p13 = scmp.ne.s32.totalorder %s3854_s1, %s2597_s20  ;;  %p2604_p5 = scmp.lt.u32.totalorder %s2597_s20, %s3854_s1 }
  0x2f   : > { %p2600_p1 = pnand %p2598_p13, %p2893_p0 }
  0x31   : > { %p2601_p6 = pneg %p2600_p1 }
  0x33   : > { %p2606_p9 = pnand %p2604_p5, %p2601_p6 }
  0x35   : > { %2609 = shalt.err (!%p2606_p9)
}
  0x36   : > { %s2610_s19 = scalar_lea.vmem %s2881_s21, 128  ;;  %p2618_p4 = scmp.lt.s32.totalorder %s2881_s21, %s2881_s21 }
  0x37   : > { %p2611_p10 = scmp.ne.s32.totalorder %s2881_s21, %s2610_s19  ;;  %p2619_p7 = scmp.lt.s32.totalorder %s2610_s19, %s2610_s19 }
  0x39   : > { %p2613_p2 = pnand %p2611_p10, %p2893_p0  ;;  %p2620_p8 = por %p2619_p7, %p2618_p4 }
  0x3b   : > { %p2614_p3 = pneg %p2613_p2 }
  0x3d   : > { %p2621_p11 = pnand %p2620_p8, %p2614_p3 }
  0x3f   : > { %2624 = shalt.err (!%p2621_p11)
}
  0x40   : > { %2495 = dma.hbm_to_vmem [thread:$0]  (!%p2877_p12), %s3854_s1, 128, %s2881_s21, [#allocation4]  }
  0x41   : > { %s2625_s10 = scalar_lea.hbm %s3856_s3, 128 }
  0x42   : > { %p2626_p13 = scmp.ne.s32.totalorder %s3856_s3, %s2625_s10  ;;  %p2632_p5 = scmp.lt.u32.totalorder %s2625_s10, %s3856_s3 }
  0x44   : > { %p2628_p1 = pnand %p2626_p13, %p2893_p0 }
  0x46   : > { %p2629_p6 = pneg %p2628_p1 }
  0x48   : > { %p2634_p9 = pnand %p2632_p5, %p2629_p6 }
  0x4a   : > { %2637 = shalt.err (!%p2634_p9)
}
  0x4b   : > { %s2638_s21 = scalar_lea.vmem %s2883_s24, 128  ;;  %p2646_p4 = scmp.lt.s32.totalorder %s2883_s24, %s2883_s24 }
  0x4c   : > { %p2639_p10 = scmp.ne.s32.totalorder %s2883_s24, %s2638_s21  ;;  %p2647_p7 = scmp.lt.s32.totalorder %s2638_s21, %s2638_s21 }
  0x4e   : > { %p2641_p2 = pnand %p2639_p10, %p2893_p0  ;;  %p2648_p8 = por %p2647_p7, %p2646_p4 }
  0x50   : > { %p2642_p3 = pneg %p2641_p2 }
  0x52   : > { %p2649_p11 = pnand %p2648_p8, %p2642_p3 }
  0x54   : > { %2652 = shalt.err (!%p2649_p11)
}
  0x55   : > { %2501 = dma.hbm_to_vmem [thread:$0]  (!%p2877_p12), %s3856_s3, 128, %s2883_s24, [#allocation7]  }
  0x56   : > { %s2760_s14 = smov [#allocation9]   ;;  %s2653_s13 = scalar_lea.hbm %s3858_s5, 512 }
  0x57   : > { %s276_s26 = sshll.u32 %s2760_s14, 4  ;;  %p2654_p13 = scmp.ne.s32.totalorder %s3858_s5, %s2653_s13  ;;  %s277_s26 = int_to_ptr.vmem [resolvable:$true] %s276_s26 }
  0x58   : > { %p2660_p5 = scmp.lt.u32.totalorder %s2653_s13, %s3858_s5 }
  0x59   : > { %p2656_p1 = pnand %p2654_p13, %p2893_p0 }
  0x5b   : > { %p2657_p6 = pneg %p2656_p1 }
  0x5d   : > { %p2662_p9 = pnand %p2660_p5, %p2657_p6 }
  0x5f   : > { %2665 = shalt.err (!%p2662_p9)
}
  0x60   : > { %s2666_s24 = scalar_lea.vmem %s277_s26, 512  ;;  %p2674_p4 = scmp.lt.s32.totalorder %s277_s26, %s277_s26 }
  0x61   : > { %p2667_p10 = scmp.ne.s32.totalorder %s277_s26, %s2666_s24  ;;  %p2675_p7 = scmp.lt.s32.totalorder %s2666_s24, %s2666_s24 }
  0x63   : > { %p2669_p2 = pnand %p2667_p10, %p2893_p0  ;;  %p2676_p8 = por %p2675_p7, %p2674_p4 }
  0x65   : > { %p2670_p3 = pneg %p2669_p2 }
  0x67   : > { %p2677_p11 = pnand %p2676_p8, %p2670_p3 }
  0x69   : > { %2680 = shalt.err (!%p2677_p11)
}
  0x6a   : > { %s2761_s19 = smov 128   ;;  %s2762_s29 = smov 8  }
  0x6b   : > { %2504 = dma.hbm_to_vmem [thread:$0]  (!%p2877_p12), %s3858_s5, 512, %s277_s26, [#allocation10], %s2761_s19, %s2761_s19, %s2762_s29  }
  0x6c   : > { %p3890_p13 = scmp.ne.s32.totalorder %s3887_s17, 0 }
  0x6e   : > { %306 = sbr.rel (%p3890_p13) target bundleno = 2042 (0x7fa), region = 52 }
  0x75   : > { %p3891_p1 = scmp.eq.s32.totalorder %s2841_s9, 0 }
  0x77   : > { %2726 = dma.done.wait (%p3891_p1), [#allocation4], 128   ;;  %p3892_p0 = pmov %p3891_p1 }
  0x79   : > { %2728 = vsyncadd (%p3892_p0), [#allocation4], 4294967168  ;;  %p3893_p6 = pmov %p3892_p0 }
  0x7a   : > { %p3894_p5 = pmov %p3892_p0 }
  0x7b   : > { %2730 = dma.done.wait (%p3893_p6), [#allocation7], 256  }
  0x7c   : > { %2732 = vsyncadd (%p3894_p5), [#allocation7], 4294967040  ;;  %p3895_p9 = pmov %p3892_p0 }
  0x7d   : > { %p3896_p12 = pmov %p3892_p0 }
  0x7e   : > { %2734 = dma.done.wait (%p3895_p9), [#allocation10], 512  }
  0x7f   : > { %2736 = vsyncadd (%p3896_p12), [#allocation10], 4294966784  ;;  %p352_p10 = scmp.lt.s32.totalorder %s2841_s9, 1  ;;  %v3879_v0 = vmov 0.0   ;;  %s2764_s13 = smov 1   ;;  %v357_v5 = vlaneseq  ;;  %v3866_v49 = vmov 1.0  }
  0x80   : > { %573 = vmatprep.mubr.f32.mxu0 %v3879_v0  ;;  %644 = vmatprep.mubr.f32.mxu1 %v3879_v0  ;;  %s2765_s20 = smov 127   ;;  %v488_v54 = vld [vmem:[#allocation3] sm:$0xff]  ;;  %vm505_vm9 = vcmask 261120   ;;  %s2767_s23 = smov 2  }
  0x81   : > { %s353_s17 = scalar_select %p352_p10, %s2841_s9, 1  ;;  %v3002_v6 = vand.u32 127, %v357_v5 }
  0x82   : > { %s2768_s25 = smov 126   ;;  %s2769_s14 = smov 3  }
  0x83   : > { %s2336_s22 = sshll.u32 %s353_s17, 5  ;;  %v359_v7 = vadd.s32 128, %v3002_v6  ;;  %v361_v8 = vadd.s32 384, %v3002_v6  ;;  %v360_v9 = vadd.s32 256, %v3002_v6  ;;  %vm427_vm2 = vcmp.ge.s32.totalorder %v3002_v6, 1  ;;  %s2770_s12 = smov 125  }
  0x84   : > { %s356_s10 = scalar_lea.vmem %s3853_s0, %s2336_s22  ;;  %vm422_vm4 = vcmp.lt.s32.totalorder %v3002_v6, 1  ;;  %v3025_v17 = vsel %vm427_vm2, 1.0, %v3879_v0  ;;  %vm459_vm5 = vcmp.lt.s32.totalorder %v3002_v6, 127  ;;  %vm893_vm2 = vcmp.lt.s32.totalorder %v3002_v6, 2  ;;  %s349_s22 = sand.u32 1, %s2747_s28  }
  0x85   : > { %v412_v1 = vld [vmem:[%s356_s10 + $0x10] sm:$0xff]  ;;  %v410_v2 = vld [vmem:[%s356_s10] sm:$0xff]  ;;  %v413_v3 = vld [vmem:[%s356_s10 + $0x18] sm:$0xff]  ;;  %v3007_v10 = vand.u32 127, %v359_v7  ;;  %v3009_v11 = vand.u32 127, %v361_v8  ;;  %v3011_v12 = vand.u32 127, %v360_v9 }
  0x86   : > { %418 = vrot.lane.b32.xlu1 %v412_v1, %s2764_s13  ;;  %414 = vrot.lane.b32.xlu0 %v410_v2, %s2764_s13  ;;  %v411_v4 = vld [vmem:[%s356_s10 + $0x8] sm:$0xff]  ;;  %v3049_v35 = vsel %vm459_vm5, 1.0, %v3879_v0  ;;  %s3765_s18 = sshll.u32 %s349_s22, 7  ;;  %s2337_s10 = sshll.u32 %s2841_s9, 11 }
  0x87   : > { %3897 = vst [vmem:[#allocation18_spill] sm:$0xff] %v3007_v10  ;;  %3898 = vst [vmem:[#allocation19_spill] sm:$0xff] %v3009_v11  ;;  %vm428_vm0 = vcmp.ge.s32.totalorder %v3007_v10, 1  ;;  %vm430_vm1 = vcmp.ge.s32.totalorder %v3009_v11, 1  ;;  %vm429_vm3 = vcmp.ge.s32.totalorder %v3011_v12, 1  ;;  %vm467_vm6 = vcmp.lt.s32.totalorder %v3009_v11, 127 }
  0x88   : > { %3899 = vst [vmem:[#allocation20_spill] sm:$0xff] %v3011_v12  ;;  %v3019_v15 = vsel %vm428_vm0, 1.0, %v3879_v0  ;;  %v3022_v16 = vsel %vm430_vm1, 1.0, %v3879_v0  ;;  %v3028_v18 = vsel %vm429_vm3, 1.0, %v3879_v0  ;;  %vm465_vm7 = vcmp.lt.s32.totalorder %v3007_v10, 127  ;;  %s3770_s26 = scalar_lea.vmem [#allocation11], %s3765_s18 }
  0x89   : > { %vm466_vm8 = vcmp.lt.s32.totalorder %v3011_v12, 127  ;;  %v3054_v37 = vsel %vm467_vm6, 1.0, %v3879_v0  ;;  %v3057_v38 = vsel %vm465_vm7, 1.0, %v3879_v0  ;;  %vm899_vm3 = vcmp.ge.s32.totalorder %v3007_v10, 2  ;;  %s3812_s9 = scalar_lea.sflag [#allocation5], %s349_s22  ;;  %p3921_p3 = scmp.ne.s32.totalorder %s3885_s15, 0 }
  0x8a   : > { %420 = vrot.lane.b32.xlu1 %v413_v3, %s2764_s13  ;;  %416 = vrot.lane.b32.xlu0 %v411_v4, %s2764_s13  ;;  %v3060_v39 = vsel %vm466_vm8, 1.0, %v3879_v0  ;;  %vm898_vm6 = vcmp.ge.s32.totalorder %v3002_v6, 2  ;;  %vm901_vm7 = vcmp.ge.s32.totalorder %v3009_v11, 2  ;;  %vm900_vm8 = vcmp.ge.s32.totalorder %v3011_v12, 2  ;;  %s2772_s24 = smov [#allocation11]  }
  0x8b   : > { %s2685_s19 = sshll.u32 %s2772_s24, 4  ;;  %s2686_s19 = int_to_ptr.vmem [resolvable:$false] %s2685_s19 }
  0x8c   : > { %s2687_s29 = scalar_lea.vmem %s2686_s19, 4096 }
  0x8e   : > { %453 = vrot.lane.b32.xlu1 %v411_v4, %s2765_s20  ;;  %451 = vrot.lane.b32.xlu0 %v410_v2, %s2765_s20 }
  0x92   : > { %457 = vrot.lane.b32.xlu1 %v413_v3, %s2765_s20  ;;  %455 = vrot.lane.b32.xlu0 %v412_v1, %s2765_s20 }
  0xf8   : > { %v419_v13 = vpop.permute.xlu1 %418  ;;  %v415_v14 = vpop.permute.xlu0 %414 }
  0xfc   : > { %v421_v19 = vpop.permute.xlu1 %420  ;;  %v417_v20 = vpop.permute.xlu0 %416 }
  0xfd   : > { %v426_v21 = vsel %vm422_vm4, %v421_v19, %v415_v14  ;;  %v424_v22 = vsel %vm422_vm4, %v417_v20, %v419_v13  ;;  %v425_v23 = vsel %vm422_vm4, %v415_v14, %v417_v20  ;;  %v423_v24 = vsel %vm422_vm4, %v419_v13, %v421_v19 }
  0xfe   : > { %v440_v25 = vmul.f32 %v3019_v15, %v425_v23  ;;  %v442_v26 = vmul.f32 %v3022_v16, %v423_v24  ;;  %v439_v27 = vmul.f32 %v3025_v17, %v426_v21  ;;  %v441_v28 = vmul.f32 %v3028_v18, %v424_v22 }
 0x100   : > { %v454_v29 = vpop.permute.xlu1 %453  ;;  %v452_v30 = vpop.permute.xlu0 %451  ;;  %v2338_v31 = vpack.c.bf16 %v411_v4, %v440_v25  ;;  %v2346_v32 = vpack.c.bf16 %v413_v3, %v442_v26  ;;  %v2340_v33 = vpack.c.bf16 %v410_v2, %v439_v27  ;;  %v2348_v34 = vpack.c.bf16 %v412_v1, %v441_v28 }
 0x101   : > { %v462_v36 = vsel %vm459_vm5, %v452_v30, %v454_v29 }
 0x102   : > { %2339 = vmatprep.subr.bf16.mxu0 %v2338_v31  ;;  %2347 = vmatprep.subr.bf16.mxu1 %v2346_v32  ;;  %v476_v42 = vmul.f32 %v3049_v35, %v462_v36 }
 0x103   : > { %2341 = vmatpush1.bf16.msra.mxu0 %v2340_v33  ;;  %2349 = vmatpush1.bf16.msra.mxu1 %v2348_v34 }
 0x104   : > { %v458_v40 = vpop.permute.xlu1 %457  ;;  %v456_v41 = vpop.permute.xlu0 %455  ;;  %v2344_v53 = vpack.c.bf16 %v3866_v49, %v476_v42 }
 0x105   : > { %v463_v43 = vsel %vm459_vm5, %v458_v40, %v452_v30  ;;  %v460_v44 = vsel %vm459_vm5, %v456_v41, %v458_v40  ;;  %v461_v45 = vsel %vm459_vm5, %v454_v29, %v456_v41 }
 0x106   : > { %v479_v46 = vmul.f32 %v3054_v37, %v463_v43  ;;  %v477_v47 = vmul.f32 %v3057_v38, %v461_v45  ;;  %v478_v48 = vmul.f32 %v3060_v39, %v460_v44 }
 0x108   : > { %v2342_v50 = vpack.c.bf16 %v3866_v49, %v477_v47  ;;  %v2350_v51 = vpack.c.bf16 %v3866_v49, %v479_v46  ;;  %v2352_v52 = vpack.c.bf16 %v3866_v49, %v478_v48  ;;  %v711_v48 = vld [vmem:[#allocation6] sm:$0xff] }
 0x10a   : > { %2343 = vmatprep.subr.bf16.mxu0 %v2342_v50  ;;  %2351 = vmatprep.subr.bf16.mxu1 %v2350_v51 }
 0x10b   : > { %2345 = vmatpush1.bf16.msra.mxu0 %v2344_v53  ;;  %2353 = vmatpush1.bf16.msra.mxu1 %v2352_v52 }
 0x10e   : > { %2297 = vmatmul.mubr.msk.f32.vlgmr.msra.gmra.mrb[0].mxu0 %vm505_vm9, %v488_v54  ;;  %2298 = vmatmul.mubr.msk.f32.vlgmr.msra.gmra.mrb[0].mxu1 %vm505_vm9, %v488_v54 }
 0x10f   : > { %795 = vmatprep.mubr.f32.mxu0 %v3879_v0  ;;  %866 = vmatprep.mubr.f32.mxu1 %v3879_v0 }
 0x1e1   : > { %v575_v55 = vpop.f32.mrb[0].mxu0  ;;  %v646_v56 = vpop.f32.mrb[0].mxu1 }
 0x1e2   : > { %vm651_vm10 = vcmp.gt.f32.partialorder %v575_v55, 0.0  ;;  %v655_v57 = vmul.f32 0.01, %v575_v55  ;;  %v577_v58 = vpop.f32.mrb[1].mxu0  ;;  %v648_v59 = vpop.f32.mrb[1].mxu1  ;;  %vm653_vm12 = vcmp.gt.f32.partialorder %v646_v56, 0.0 }
 0x1e3   : > { %vm652_vm11 = vcmp.gt.f32.partialorder %v577_v58, 0.0  ;;  %v656_v60 = vmul.f32 0.01, %v577_v58  ;;  %v657_v61 = vmul.f32 0.01, %v646_v56  ;;  %vm654_vm13 = vcmp.gt.f32.partialorder %v648_v59, 0.0 }
 0x1e4   : > { %v659_v62 = vsel %vm651_vm10, %v575_v55, %v655_v57  ;;  %v658_v63 = vmul.f32 0.01, %v648_v59  ;;  %vm976_vm10 = vcmp.lt.s32.totalorder %v3007_v10, 126 }
 0x1e5   : > { %663 = vrot.lane.b32.xlu0 %v659_v62, %s2764_s13  ;;  %v660_v1 = vsel %vm652_vm11, %v577_v58, %v656_v60  ;;  %v661_v2 = vsel %vm653_vm12, %v646_v56, %v657_v61  ;;  %vm977_vm11 = vcmp.lt.s32.totalorder %v3011_v12, 126  ;;  %vm978_vm12 = vcmp.lt.s32.totalorder %v3009_v11, 126 }
 0x1e6   : > { %665 = vrot.lane.b32.xlu1 %v660_v1, %s2764_s13  ;;  %v662_v3 = vsel %vm654_vm13, %v648_v59, %v658_v63  ;;  %vm1024_vm13 = vcmask 392192  }
 0x1e9   : > { %667 = vrot.lane.b32.xlu0 %v661_v2, %s2764_s13 }
 0x1ea   : > { %669 = vrot.lane.b32.xlu1 %v662_v3, %s2764_s13 }
 0x1ed   : > { %687 = vrot.lane.b32.xlu0 %v659_v62, %s2765_s20 }
 0x1ee   : > { %689 = vrot.lane.b32.xlu1 %v660_v1, %s2765_s20 }
 0x1f1   : > { %691 = vrot.lane.b32.xlu0 %v661_v2, %s2765_s20 }
 0x1f2   : > { %693 = vrot.lane.b32.xlu1 %v662_v3, %s2765_s20 }
 0x257   : > { %v664_v4 = vpop.permute.xlu0 %663 }
 0x258   : > { %v666_v5 = vpop.permute.xlu1 %665 }
 0x259   : > { %v673_v7 = vsel %vm422_vm4, %v664_v4, %v666_v5 }
 0x25a   : > { %v676_v8 = vmul.f32 %v3019_v15, %v673_v7 }
 0x25b   : > { %v668_v9 = vpop.permute.xlu0 %667 }
 0x25c   : > { %v672_v13 = vsel %vm422_vm4, %v666_v5, %v668_v9  ;;  %v670_v14 = vpop.permute.xlu1 %669  ;;  %v2354_v19 = vpack.c.bf16 %v660_v1, %v676_v8 }
 0x25d   : > { %v677_v20 = vmul.f32 %v3028_v18, %v672_v13  ;;  %v671_v21 = vsel %vm422_vm4, %v668_v9, %v670_v14  ;;  %v674_v22 = vsel %vm422_vm4, %v670_v14, %v664_v4  ;;  %v3175_v14 = vsel %vm898_vm6, 1.0, %v3879_v0 }
 0x25e   : > { %v675_v23 = vmul.f32 %v3025_v17, %v674_v22  ;;  %v678_v24 = vmul.f32 %v3022_v16, %v671_v21  ;;  %2355 = vmatprep.subr.bf16.mxu0 %v2354_v19  ;;  %v3178_v19 = vsel %vm901_vm7, 1.0, %v3879_v0 }
 0x25f   : > { %v688_v25 = vpop.permute.xlu0 %687  ;;  %v2364_v29 = vpack.c.bf16 %v661_v2, %v677_v20 }
 0x260   : > { %v2356_v26 = vpack.c.bf16 %v659_v62, %v675_v23  ;;  %v690_v27 = vpop.permute.xlu1 %689  ;;  %v2362_v28 = vpack.c.bf16 %v662_v3, %v678_v24  ;;  %v3163_v3 = vsel %vm899_vm3, 1.0, %v3879_v0  ;;  %v3185_v23 = vsel %vm900_vm8, 1.0, %v3879_v0 }
 0x261   : > { %v697_v30 = vsel %vm459_vm5, %v688_v25, %v690_v27 }
 0x262   : > { %2357 = vmatpush1.bf16.msra.mxu0 %v2356_v26  ;;  %2363 = vmatprep.subr.bf16.mxu1 %v2362_v28  ;;  %v699_v32 = vmul.f32 %v3049_v35, %v697_v30 }
 0x263   : > { %v692_v31 = vpop.permute.xlu0 %691  ;;  %2365 = vmatpush1.bf16.msra.mxu1 %v2364_v29 }
 0x264   : > { %v696_v33 = vsel %vm459_vm5, %v690_v27, %v692_v31  ;;  %v694_v34 = vpop.permute.xlu1 %693  ;;  %v2360_v45 = vpack.c.bf16 %v3866_v49, %v699_v32 }
 0x265   : > { %v700_v36 = vmul.f32 %v3057_v38, %v696_v33  ;;  %v695_v40 = vsel %vm459_vm5, %v692_v31, %v694_v34  ;;  %v698_v41 = vsel %vm459_vm5, %v694_v34, %v688_v25 }
 0x266   : > { %v701_v42 = vmul.f32 %v3060_v39, %v695_v40  ;;  %v702_v43 = vmul.f32 %v3054_v37, %v698_v41 }
 0x267   : > { %v2358_v44 = vpack.c.bf16 %v3866_v49, %v700_v36 }
 0x268   : > { %v2368_v46 = vpack.c.bf16 %v3866_v49, %v701_v42  ;;  %v2366_v47 = vpack.c.bf16 %v3866_v49, %v702_v43 }
 0x269   : > { %2359 = vmatprep.subr.bf16.mxu0 %v2358_v44 }
 0x26a   : > { %2361 = vmatpush1.bf16.msra.mxu0 %v2360_v45  ;;  %2367 = vmatprep.subr.bf16.mxu1 %v2366_v47 }
 0x26b   : > { %2369 = vmatpush1.bf16.msra.mxu1 %v2368_v46 }
 0x26d   : > { %2299 = vmatmul.mubr.msk.f32.vlgmr.msra.gmra.mrb[2].mxu0 %vm505_vm9, %v711_v48 }
 0x26e   : > { %2300 = vmatmul.mubr.msk.f32.vlgmr.msra.gmra.mrb[2].mxu1 %vm505_vm9, %v711_v48  ;;  %1092 = vmatprep.mubr.f32.mxu0 %v3879_v0  ;;  %vm970_vm9 = vcmp.lt.s32.totalorder %v3002_v6, 126 }
 0x26f   : > { %1163 = vmatprep.mubr.f32.mxu1 %v3879_v0 }
 0x340   : > { %v797_v50 = vpop.f32.mrb[2].mxu0 }
 0x341   : > { %vm873_vm14 = vcmp.gt.f32.partialorder %v797_v50, 0.0  ;;  %v877_v51 = vmul.f32 0.01, %v797_v50  ;;  %v799_v52 = vpop.f32.mrb[3].mxu0  ;;  %v868_v53 = vpop.f32.mrb[2].mxu1 }
 0x342   : > { %vm874_vm15 = vcmp.gt.f32.partialorder %v799_v52, 0.0  ;;  %v878_v54 = vmul.f32 0.01, %v799_v52  ;;  %v879_v56 = vmul.f32 0.01, %v868_v53  ;;  %v870_v57 = vpop.f32.mrb[3].mxu1 }
 0x343   : > { %v3120_v55 = vsel %vm873_vm14, %v797_v50, %v877_v51  ;;  %vm875_vm0 = vcmp.gt.f32.partialorder %v868_v53, 0.0  ;;  %v880_v59 = vmul.f32 0.01, %v870_v57  ;;  %vm876_vm1 = vcmp.gt.f32.partialorder %v870_v57, 0.0 }
 0x344   : > { %v3122_v58 = vsel %vm874_vm15, %v799_v52, %v878_v54  ;;  %885 = vrot.lane.b32.xlu0 %v3120_v55, %s2767_s23  ;;  %v3128_v60 = vsel %vm875_vm0, %v868_v53, %v879_v56 }
 0x345   : > { %887 = vrot.lane.b32.xlu1 %v3122_v58, %s2767_s23  ;;  %v3130_v61 = vsel %vm876_vm1, %v870_v57, %v880_v59 }
 0x348   : > { %889 = vrot.lane.b32.xlu0 %v3128_v60, %s2767_s23 }
 0x349   : > { %891 = vrot.lane.b32.xlu1 %v3130_v61, %s2767_s23 }
 0x34c   : > { %918 = vrot.lane.b32.xlu0 %v3120_v55, %s2764_s13 }
 0x34d   : > { %920 = vrot.lane.b32.xlu1 %v3122_v58, %s2764_s13 }
 0x350   : > { %922 = vrot.lane.b32.xlu0 %v3128_v60, %s2764_s13 }
 0x351   : > { %924 = vrot.lane.b32.xlu1 %v3130_v61, %s2764_s13 }
 0x354   : > { %942 = vrot.lane.b32.xlu0 %v3120_v55, %s2765_s20 }
 0x355   : > { %944 = vrot.lane.b32.xlu1 %v3122_v58, %s2765_s20 }
 0x358   : > { %946 = vrot.lane.b32.xlu0 %v3128_v60, %s2765_s20 }
 0x359   : > { %948 = vrot.lane.b32.xlu1 %v3130_v61, %s2765_s20 }
 0x35c   : > { %962 = vrot.lane.b32.xlu0 %v3120_v55, %s2768_s25 }
 0x35d   : > { %964 = vrot.lane.b32.xlu1 %v3122_v58, %s2768_s25 }
 0x360   : > { %966 = vrot.lane.b32.xlu0 %v3128_v60, %s2768_s25 }
 0x361   : > { %968 = vrot.lane.b32.xlu1 %v3130_v61, %s2768_s25 }
 0x3b6   : > { %v886_v62 = vpop.permute.xlu0 %885 }
 0x3b7   : > { %v888_v63 = vpop.permute.xlu1 %887 }
 0x3b8   : > { %v896_v4 = vsel %vm893_vm2, %v886_v62, %v888_v63 }
 0x3b9   : > { %v911_v9 = vmul.f32 %v3163_v3, %v896_v4  ;;  %v3224_v4 = vsel %vm970_vm9, 1.0, %v3879_v0 }
 0x3ba   : > { %v890_v1 = vpop.permute.xlu0 %889 }
 0x3bb   : > { %v892_v2 = vpop.permute.xlu1 %891  ;;  %v895_v24 = vsel %vm893_vm2, %v888_v63, %v890_v1 }
 0x3bc   : > { %v894_v20 = vsel %vm893_vm2, %v890_v1, %v892_v2  ;;  %v897_v21 = vsel %vm893_vm2, %v892_v2, %v886_v62  ;;  %v912_v36 = vmul.f32 %v3185_v23, %v895_v24 }
 0x3bd   : > { %v910_v31 = vmul.f32 %v3175_v14, %v897_v21  ;;  %v913_v32 = vmul.f32 %v3178_v19, %v894_v20 }
 0x3be   : > { %v919_v5 = vpop.permute.xlu0 %918 }
 0x3bf   : > { %v921_v7 = vpop.permute.xlu1 %920 }
 0x3c0   : > { %v928_v8 = vsel %vm422_vm4, %v919_v5, %v921_v7 }
 0x3c1   : > { %v931_v13 = vmul.f32 %v3019_v15, %v928_v8 }
 0x3c2   : > { %v923_v22 = vpop.permute.xlu0 %922 }
 0x3c3   : > { %v927_v25 = vsel %vm422_vm4, %v921_v7, %v923_v22  ;;  %v925_v26 = vpop.permute.xlu1 %924  ;;  %v2370_v27 = vpack.c.bf16 %v931_v13, %v911_v9 }
 0x3c4   : > { %v932_v28 = vmul.f32 %v3028_v18, %v927_v25  ;;  %v926_v29 = vsel %vm422_vm4, %v923_v22, %v925_v26  ;;  %v929_v30 = vsel %vm422_vm4, %v925_v26, %v919_v5  ;;  %v3235_v5 = vsel %vm978_vm12, 1.0, %v3879_v0 }
 0x3c5   : > { %v930_v33 = vmul.f32 %v3025_v17, %v929_v30  ;;  %v933_v34 = vmul.f32 %v3022_v16, %v926_v29  ;;  %2371 = vmatprep.subr.bf16.mxu0 %v2370_v27  ;;  %3902 = vst [vmem:[#allocation23_spill] sm:$0xff] %v3235_v5  ;;  %v999_v29 = vld [vmem:[#allocation8] sm:$0xff] }
 0x3c6   : > { %v943_v40 = vpop.permute.xlu0 %942  ;;  %v2384_v44 = vpack.c.bf16 %v932_v28, %v912_v36 }
 0x3c7   : > { %v2372_v41 = vpack.c.bf16 %v930_v33, %v910_v31  ;;  %v945_v42 = vpop.permute.xlu1 %944  ;;  %v2382_v43 = vpack.c.bf16 %v933_v34, %v913_v32 }
 0x3c8   : > { %v952_v45 = vsel %vm459_vm5, %v943_v40, %v945_v42 }
 0x3c9   : > { %2373 = vmatpush1.bf16.msra.mxu0 %v2372_v41  ;;  %2383 = vmatprep.subr.bf16.mxu1 %v2382_v43  ;;  %v954_v47 = vmul.f32 %v3049_v35, %v952_v45 }
 0x3ca   : > { %v947_v46 = vpop.permute.xlu0 %946  ;;  %2385 = vmatpush1.bf16.msra.mxu1 %v2384_v44 }
 0x3cb   : > { %v951_v48 = vsel %vm459_vm5, %v945_v42, %v947_v46  ;;  %v949_v50 = vpop.permute.xlu1 %948  ;;  %v2376_v62 = vpack.c.bf16 %v954_v47, %v3120_v55  ;;  %v3229_v55 = vsel %vm976_vm10, 1.0, %v3879_v0 }
 0x3cc   : > { %v955_v51 = vmul.f32 %v3057_v38, %v951_v48  ;;  %v950_v52 = vsel %vm459_vm5, %v947_v46, %v949_v50  ;;  %v953_v53 = vsel %vm459_vm5, %v949_v50, %v943_v40  ;;  %3900 = vst [vmem:[#allocation21_spill] sm:$0xff] %v3229_v55 }
 0x3cd   : > { %v956_v54 = vmul.f32 %v3060_v39, %v950_v52  ;;  %v957_v56 = vmul.f32 %v3054_v37, %v953_v53 }
 0x3ce   : > { %v963_v57 = vpop.permute.xlu0 %962  ;;  %v2374_v59 = vpack.c.bf16 %v955_v51, %v3122_v58 }
 0x3cf   : > { %v2388_v63 = vpack.c.bf16 %v956_v54, %v3128_v60  ;;  %v965_v1 = vpop.permute.xlu1 %964  ;;  %v2386_v2 = vpack.c.bf16 %v957_v56, %v3130_v61  ;;  %v3232_v61 = vsel %vm977_vm11, 1.0, %v3879_v0 }
 0x3d0   : > { %v973_v58 = vsel %vm970_vm9, %v963_v57, %v965_v1  ;;  %2375 = vmatprep.subr.bf16.mxu0 %v2374_v59  ;;  %3901 = vst [vmem:[#allocation22_spill] sm:$0xff] %v3232_v61 }
 0x3d1   : > { %2377 = vmatpush1.bf16.msra.mxu0 %v2376_v62  ;;  %2387 = vmatprep.subr.bf16.mxu1 %v2386_v2  ;;  %v987_v7 = vmul.f32 %v3224_v4, %v973_v58 }
 0x3d2   : > { %v967_v60 = vpop.permute.xlu0 %966  ;;  %2389 = vmatpush1.bf16.msra.mxu1 %v2388_v63 }
 0x3d3   : > { %v972_v8 = vsel %vm970_vm9, %v965_v1, %v967_v60  ;;  %v969_v9 = vpop.permute.xlu1 %968  ;;  %v2380_v26 = vpack.c.bf16 %v3866_v49, %v987_v7 }
 0x3d4   : > { %v988_v13 = vmul.f32 %v3229_v55, %v972_v8  ;;  %v971_v20 = vsel %vm970_vm9, %v967_v60, %v969_v9  ;;  %v974_v21 = vsel %vm970_vm9, %v969_v9, %v963_v57 }
 0x3d5   : > { %v989_v22 = vmul.f32 %v3232_v61, %v971_v20  ;;  %v990_v24 = vmul.f32 %v3235_v5, %v974_v21 }
 0x3d6   : > { %v2378_v25 = vpack.c.bf16 %v3866_v49, %v988_v13 }
 0x3d7   : > { %v2392_v27 = vpack.c.bf16 %v3866_v49, %v989_v22  ;;  %v2390_v28 = vpack.c.bf16 %v3866_v49, %v990_v24 }
 0x3d8   : > { %2379 = vmatprep.subr.bf16.mxu0 %v2378_v25 }
 0x3d9   : > { %2381 = vmatpush1.bf16.msra.mxu0 %v2380_v26  ;;  %2391 = vmatprep.subr.bf16.mxu1 %v2390_v28 }
 0x3da   : > { %2393 = vmatpush1.bf16.msra.mxu1 %v2392_v27 }
 0x3dc   : > { %2309 = vmatmul.mubr.msk.f32.vlgmr.msra.gmra.mrb[4].mxu0 %vm1024_vm13, %v999_v29 }
 0x3dd   : > { %2310 = vmatmul.mubr.msk.f32.vlgmr.msra.gmra.mrb[4].mxu1 %vm1024_vm13, %v999_v29  ;;  %1366 = vmatprep.mubr.f32.mxu0 %v3879_v0 }
 0x3de   : > { %1443 = vmatprep.mubr.f32.mxu1 %v3879_v0 }
 0x4af   : > { %v1094_v30 = vpop.f32.mrb[4].mxu0 }
 0x4b0   : > { %vm1170_vm14 = vcmp.gt.f32.partialorder %v1094_v30, 0.0  ;;  %v1174_v31 = vmul.f32 0.01, %v1094_v30  ;;  %v1096_v32 = vpop.f32.mrb[5].mxu0  ;;  %v1165_v33 = vpop.f32.mrb[4].mxu1 }
 0x4b1   : > { %vm1171_vm15 = vcmp.gt.f32.partialorder %v1096_v32, 0.0  ;;  %v1175_v34 = vmul.f32 0.01, %v1096_v32  ;;  %v1176_v40 = vmul.f32 0.01, %v1165_v33  ;;  %v1167_v41 = vpop.f32.mrb[5].mxu1 }
 0x4b2   : > { %v3255_v36 = vsel %vm1170_vm14, %v1094_v30, %v1174_v31  ;;  %vm1172_vm0 = vcmp.gt.f32.partialorder %v1165_v33, 0.0  ;;  %v1177_v43 = vmul.f32 0.01, %v1167_v41  ;;  %vm1173_vm1 = vcmp.gt.f32.partialorder %v1167_v41, 0.0 }
 0x4b3   : > { %v3257_v42 = vsel %vm1171_vm15, %v1096_v32, %v1175_v34  ;;  %1182 = vrot.lane.b32.xlu0 %v3255_v36, %s2767_s23  ;;  %v3263_v44 = vsel %vm1172_vm0, %v1165_v33, %v1176_v40  ;;  %vm1496_vm14 = vcmp.lt.s32.totalorder %v3002_v6, 3  ;;  %vm1506_vm15 = vcmp.ge.s32.totalorder %v3007_v10, 3 }
 0x4b4   : > { %1184 = vrot.lane.b32.xlu1 %v3257_v42, %s2767_s23  ;;  %v3265_v45 = vsel %vm1173_vm1, %v1167_v41, %v1177_v43  ;;  %vm1505_vm0 = vcmp.ge.s32.totalorder %v3002_v6, 3  ;;  %vm1508_vm1 = vcmp.ge.s32.totalorder %v3009_v11, 3 }
 0x4b7   : > { %1186 = vrot.lane.b32.xlu0 %v3263_v44, %s2767_s23 }
 0x4b8   : > { %1188 = vrot.lane.b32.xlu1 %v3265_v45, %s2767_s23 }
 0x4bb   : > { %1202 = vrot.lane.b32.xlu0 %v3255_v36, %s2764_s13 }
 0x4bc   : > { %1204 = vrot.lane.b32.xlu1 %v3257_v42, %s2764_s13 }
 0x4bf   : > { %1206 = vrot.lane.b32.xlu0 %v3263_v44, %s2764_s13 }
 0x4c0   : > { %1208 = vrot.lane.b32.xlu1 %v3265_v45, %s2764_s13 }
 0x4c3   : > { %1226 = vrot.lane.b32.xlu0 %v3255_v36, %s2765_s20 }
 0x4c4   : > { %1228 = vrot.lane.b32.xlu1 %v3257_v42, %s2765_s20 }
 0x4c7   : > { %1230 = vrot.lane.b32.xlu0 %v3263_v44, %s2765_s20 }
 0x4c8   : > { %1232 = vrot.lane.b32.xlu1 %v3265_v45, %s2765_s20 }
 0x4cb   : > { %1246 = vrot.lane.b32.xlu0 %v3255_v36, %s2768_s25 }
 0x4cc   : > { %1248 = vrot.lane.b32.xlu1 %v3257_v42, %s2768_s25 }
 0x4cf   : > { %1250 = vrot.lane.b32.xlu0 %v3263_v44, %s2768_s25 }
 0x4d0   : > { %1252 = vrot.lane.b32.xlu1 %v3265_v45, %s2768_s25 }
 0x525   : > { %v1183_v46 = vpop.permute.xlu0 %1182 }
 0x526   : > { %v1185_v47 = vpop.permute.xlu1 %1184 }
 0x527   : > { %v1192_v51 = vsel %vm893_vm2, %v1183_v46, %v1185_v47 }
 0x528   : > { %v1195_v56 = vmul.f32 %v3163_v3, %v1192_v51 }
 0x529   : > { %v1187_v48 = vpop.permute.xlu0 %1186 }
 0x52a   : > { %v1189_v50 = vpop.permute.xlu1 %1188  ;;  %v1191_v1 = vsel %vm893_vm2, %v1185_v47, %v1187_v48 }
 0x52b   : > { %v1190_v59 = vsel %vm893_vm2, %v1187_v48, %v1189_v50  ;;  %v1193_v62 = vsel %vm893_vm2, %v1189_v50, %v1183_v46  ;;  %v1196_v24 = vmul.f32 %v3185_v23, %v1191_v1 }
 0x52c   : > { %v1194_v13 = vmul.f32 %v3175_v14, %v1193_v62  ;;  %v1197_v20 = vmul.f32 %v3178_v19, %v1190_v59 }
 0x52d   : > { %v1203_v52 = vpop.permute.xlu0 %1202 }
 0x52e   : > { %v1205_v53 = vpop.permute.xlu1 %1204 }
 0x52f   : > { %v1212_v54 = vsel %vm422_vm4, %v1203_v52, %v1205_v53 }
 0x530   : > { %v1215_v57 = vmul.f32 %v3019_v15, %v1212_v54 }
 0x531   : > { %v1207_v63 = vpop.permute.xlu0 %1206 }
 0x532   : > { %v1211_v2 = vsel %vm422_vm4, %v1205_v53, %v1207_v63  ;;  %v1209_v58 = vpop.permute.xlu1 %1208  ;;  %v2394_v60 = vpack.c.bf16 %v1215_v57, %v1195_v56 }
 0x533   : > { %v1216_v7 = vmul.f32 %v3028_v18, %v1211_v2  ;;  %v1210_v8 = vsel %vm422_vm4, %v1207_v63, %v1209_v58  ;;  %v1213_v9 = vsel %vm422_vm4, %v1209_v58, %v1203_v52 }
 0x534   : > { %v1214_v21 = vmul.f32 %v3025_v17, %v1213_v9  ;;  %v1217_v22 = vmul.f32 %v3022_v16, %v1210_v8  ;;  %2395 = vmatprep.subr.bf16.mxu0 %v2394_v60  ;;  %v1270_v8 = vld [vmem:[%s3857_s4] sm:$0xff]  ;;  %v1271_v9 = vld [vmem:[%s3857_s4 + $0x8] sm:$0xff] }
 0x535   : > { %v1227_v25 = vpop.permute.xlu0 %1226  ;;  %v2408_v29 = vpack.c.bf16 %v1216_v7, %v1196_v24 }
 0x536   : > { %v2396_v26 = vpack.c.bf16 %v1214_v21, %v1194_v13  ;;  %v1229_v27 = vpop.permute.xlu1 %1228  ;;  %v2406_v28 = vpack.c.bf16 %v1217_v22, %v1197_v20 }
 0x537   : > { %v1236_v30 = vsel %vm459_vm5, %v1227_v25, %v1229_v27 }
 0x538   : > { %2397 = vmatpush1.bf16.msra.mxu0 %v2396_v26  ;;  %2407 = vmatprep.subr.bf16.mxu1 %v2406_v28  ;;  %v1238_v32 = vmul.f32 %v3049_v35, %v1236_v30 }
 0x539   : > { %v1231_v31 = vpop.permute.xlu0 %1230  ;;  %2409 = vmatpush1.bf16.msra.mxu1 %v2408_v29 }
 0x53a   : > { %v1235_v33 = vsel %vm459_vm5, %v1229_v27, %v1231_v31  ;;  %v1233_v34 = vpop.permute.xlu1 %1232  ;;  %v2400_v51 = vpack.c.bf16 %v1238_v32, %v3255_v36 }
 0x53b   : > { %v1239_v40 = vmul.f32 %v3057_v38, %v1235_v33  ;;  %v1234_v41 = vsel %vm459_vm5, %v1231_v31, %v1233_v34  ;;  %v1237_v43 = vsel %vm459_vm5, %v1233_v34, %v1227_v25 }
 0x53c   : > { %v1240_v46 = vmul.f32 %v3060_v39, %v1234_v41  ;;  %v1241_v47 = vmul.f32 %v3054_v37, %v1237_v43 }
 0x53d   : > { %v1247_v48 = vpop.permute.xlu0 %1246  ;;  %v2398_v50 = vpack.c.bf16 %v1239_v40, %v3257_v42  ;;  %v2318_v40 = vsel %vm1508_vm1, 1.0, %v3879_v0 }
 0x53e   : > { %v2412_v52 = vpack.c.bf16 %v1240_v46, %v3263_v44  ;;  %v1249_v53 = vpop.permute.xlu1 %1248  ;;  %v2410_v54 = vpack.c.bf16 %v1241_v47, %v3265_v45 }
 0x53f   : > { %v1256_v56 = vsel %vm970_vm9, %v1247_v48, %v1249_v53  ;;  %2399 = vmatprep.subr.bf16.mxu0 %v2398_v50 }
 0x540   : > { %2401 = vmatpush1.bf16.msra.mxu0 %v2400_v51  ;;  %2411 = vmatprep.subr.bf16.mxu1 %v2410_v54  ;;  %v1258_v59 = vmul.f32 %v3224_v4, %v1256_v56  ;;  %v2061_v56 = vld [vmem:[%s3859_s6] sm:$0xff] }
 0x541   : > { %v1251_v57 = vpop.permute.xlu0 %1250  ;;  %2413 = vmatpush1.bf16.msra.mxu1 %v2412_v52 }
 0x542   : > { %v1255_v42 = vsel %vm970_vm9, %v1249_v53, %v1251_v57  ;;  %v1253_v62 = vpop.permute.xlu1 %1252  ;;  %v2404_v58 = vpack.c.bf16 %v3866_v49, %v1258_v59  ;;  %v2771_v59 = vmov 0  }
 0x543   : > { %v1259_v36 = vmul.f32 %v3229_v55, %v1255_v42  ;;  %v1254_v44 = vsel %vm970_vm9, %v1251_v57, %v1253_v62  ;;  %v1257_v45 = vsel %vm970_vm9, %v1253_v62, %v1247_v48  ;;  %v2062_v57 = vld [vmem:[%s3859_s6 + $0x8] sm:$0xff]  ;;  %2568 = vset.pattern.permute.xlu1 %v2771_v59  ;;  %2567 = vset.pattern.permute.xlu0 %v2771_v59  ;;  %v2064_v42 = vld [vmem:[%s3859_s6 + $0x18] sm:$0xff]  ;;  %v2063_v62 = vld [vmem:[%s3859_s6 + $0x10] sm:$0xff]  ;;  %v2316_v59 = vsel %vm1506_vm15, 1.0, %v3879_v0 }
 0x544   : > { %v1260_v63 = vmul.f32 %v3232_v61, %v1254_v44  ;;  %v1261_v1 = vmul.f32 %v3235_v5, %v1257_v45  ;;  %v2101_v44 = vld [vmem:[%s3860_s7] sm:$0xff] }
 0x545   : > { %v2402_v2 = vpack.c.bf16 %v3866_v49, %v1259_v36  ;;  %v2102_v36 = vld [vmem:[%s3860_s7 + $0x8] sm:$0xff] }
 0x546   : > { %v2416_v60 = vpack.c.bf16 %v3866_v49, %v1260_v63  ;;  %v2414_v7 = vpack.c.bf16 %v3866_v49, %v1261_v1  ;;  %v2104_v63 = vld [vmem:[%s3860_s7 + $0x18] sm:$0xff]  ;;  %v2103_v1 = vld [vmem:[%s3860_s7 + $0x10] sm:$0xff] }
 0x547   : > { %2403 = vmatprep.subr.bf16.mxu0 %v2402_v2 }
 0x548   : > { %2405 = vmatpush1.bf16.msra.mxu0 %v2404_v58  ;;  %2415 = vmatprep.subr.bf16.mxu1 %v2414_v7 }
 0x549   : > { %2417 = vmatpush1.bf16.msra.mxu1 %v2416_v60 }
 0x54b   : > { %2311 = vmatmul.mubr.msk.f32.vlgmr.msra.gmra.mrb[6].mxu0 %vm1024_vm13, %v1270_v8 }
 0x54c   : > { %2313 = vmatmul.mubr.msk.f32.vlgmr.msra.gmra.mrb[6].mxu1 %vm1024_vm13, %v1270_v8  ;;  %1372 = vmatprep.mubr.f32.mxu0 %v3879_v0 }
 0x54d   : > { %1449 = vmatprep.mubr.f32.mxu1 %v3879_v0 }
 0x54f   : > { %2312 = vmatmul.mubr.msk.f32.gmra.mrb[8].mxu0 %vm1024_vm13, %v1271_v9 }
 0x550   : > { %2314 = vmatmul.mubr.msk.f32.gmra.mrb[8].mxu1 %vm1024_vm13, %v1271_v9  ;;  %1899 = vmatprep.mubr.f32.mxu0 %v3879_v0 }
 0x551   : > { %1988 = vmatprep.mubr.f32.mxu1 %v3879_v0 }
 0x61e   : > { %v1368_v13 = vpop.f32.mrb[6].mxu0 }
 0x61f   : > { %vm1456_vm3 = vcmp.gt.f32.partialorder %v1368_v13, 0.0  ;;  %v1464_v20 = vmul.f32 0.01, %v1368_v13  ;;  %v1370_v21 = vpop.f32.mrb[7].mxu0  ;;  %v1445_v22 = vpop.f32.mrb[6].mxu1 }
 0x620   : > { %v1466_v25 = vmul.f32 0.01, %v1445_v22  ;;  %v1447_v26 = vpop.f32.mrb[7].mxu1  ;;  %vm1458_vm6 = vcmp.gt.f32.partialorder %v1445_v22, 0.0  ;;  %v1465_v46 = vmul.f32 0.01, %v1370_v21 }
 0x621   : > { %v3365_v24 = vsel %vm1456_vm3, %v1368_v13, %v1464_v20  ;;  %vm1457_vm10 = vcmp.gt.f32.partialorder %v1370_v21, 0.0  ;;  %v1467_v48 = vmul.f32 0.01, %v1447_v26  ;;  %vm1459_vm11 = vcmp.gt.f32.partialorder %v1447_v26, 0.0 }
 0x622   : > { %1480 = vrot.lane.b32.xlu0 %v3365_v24, %s2769_s14  ;;  %v1374_v27 = vpop.f32.mrb[8].mxu0  ;;  %v3369_v32 = vsel %vm1458_vm6, %v1445_v22, %v1466_v25  ;;  %v3423_v47 = vsel %vm1457_vm10, %v1370_v21, %v1465_v46  ;;  %vm1507_vm3 = vcmp.ge.s32.totalorder %v3011_v12, 3  ;;  %vm1822_vm6 = vcmask 982016  }
 0x623   : > { %vm1460_vm7 = vcmp.gt.f32.partialorder %v1374_v27, 0.0  ;;  %v1468_v28 = vmul.f32 0.01, %v1374_v27  ;;  %v1376_v29 = vpop.f32.mrb[9].mxu0  ;;  %v1451_v30 = vpop.f32.mrb[8].mxu1  ;;  %v3429_v51 = vsel %vm1459_vm11, %v1447_v26, %v1467_v48  ;;  %v2317_v11 = vsel %vm1507_vm3, 1.0, %v3879_v0 }
 0x624   : > { %vm1462_vm8 = vcmp.gt.f32.partialorder %v1451_v30, 0.0  ;;  %v1453_v31 = vpop.f32.mrb[9].mxu1  ;;  %v1470_v34 = vmul.f32 0.01, %v1451_v30  ;;  %v1469_v50 = vmul.f32 0.01, %v1376_v29 }
 0x625   : > { %v3371_v33 = vsel %vm1460_vm7, %v1374_v27, %v1468_v28  ;;  %vm1461_vm12 = vcmp.gt.f32.partialorder %v1376_v29, 0.0  ;;  %v1471_v53 = vmul.f32 0.01, %v1453_v31  ;;  %vm1463_vm13 = vcmp.gt.f32.partialorder %v1453_v31, 0.0 }
 0x626   : > { %1482 = vrot.lane.b32.xlu1 %v3371_v33, %s2769_s14  ;;  %1488 = vrot.lane.b32.xlu0 %v3369_v32, %s2769_s14  ;;  %v3379_v41 = vsel %vm1462_vm8, %v1451_v30, %v1470_v34  ;;  %v3431_v52 = vsel %vm1461_vm12, %v1376_v29, %v1469_v50 }
 0x627   : > { %v3437_v54 = vsel %vm1463_vm13, %v1453_v31, %v1471_v53 }
 0x62a   : > { %1533 = vrot.lane.b32.xlu0 %v3365_v24, %s2767_s23  ;;  %1490 = vrot.lane.b32.xlu1 %v3379_v41, %s2769_s14 }
 0x62e   : > { %1541 = vrot.lane.b32.xlu0 %v3369_v32, %s2767_s23  ;;  %1535 = vrot.lane.b32.xlu1 %v3371_v33, %s2767_s23 }
 0x632   : > { %1573 = vrot.lane.b32.xlu0 %v3365_v24, %s2764_s13  ;;  %1543 = vrot.lane.b32.xlu1 %v3379_v41, %s2767_s23 }
 0x636   : > { %1581 = vrot.lane.b32.xlu0 %v3369_v32, %s2764_s13  ;;  %1575 = vrot.lane.b32.xlu1 %v3371_v33, %s2764_s13 }
 0x63a   : > { %1621 = vrot.lane.b32.xlu0 %v3365_v24, %s2765_s20  ;;  %1583 = vrot.lane.b32.xlu1 %v3379_v41, %s2764_s13 }
 0x63e   : > { %1629 = vrot.lane.b32.xlu0 %v3369_v32, %s2765_s20  ;;  %1623 = vrot.lane.b32.xlu1 %v3371_v33, %s2765_s20 }
 0x642   : > { %1661 = vrot.lane.b32.xlu0 %v3365_v24, %s2768_s25  ;;  %1631 = vrot.lane.b32.xlu1 %v3379_v41, %s2765_s20 }
 0x646   : > { %1669 = vrot.lane.b32.xlu0 %v3369_v32, %s2768_s25  ;;  %1663 = vrot.lane.b32.xlu1 %v3371_v33, %s2768_s25 }
 0x64a   : > { %1701 = vrot.lane.b32.xlu0 %v3365_v24, %s2770_s12  ;;  %1671 = vrot.lane.b32.xlu1 %v3379_v41, %s2768_s25 }
 0x64e   : > { %1709 = vrot.lane.b32.xlu0 %v3369_v32, %s2770_s12  ;;  %1703 = vrot.lane.b32.xlu1 %v3371_v33, %s2770_s12 }
 0x652   : > { %1484 = vrot.lane.b32.xlu0 %v3423_v47, %s2769_s14  ;;  %1711 = vrot.lane.b32.xlu1 %v3379_v41, %s2770_s12 }
 0x656   : > { %1492 = vrot.lane.b32.xlu0 %v3429_v51, %s2769_s14  ;;  %1486 = vrot.lane.b32.xlu1 %v3431_v52, %s2769_s14 }
 0x65a   : > { %1537 = vrot.lane.b32.xlu0 %v3423_v47, %s2767_s23  ;;  %1494 = vrot.lane.b32.xlu1 %v3437_v54, %s2769_s14 }
 0x65e   : > { %1545 = vrot.lane.b32.xlu0 %v3429_v51, %s2767_s23  ;;  %1539 = vrot.lane.b32.xlu1 %v3431_v52, %s2767_s23 }
 0x662   : > { %1577 = vrot.lane.b32.xlu0 %v3423_v47, %s2764_s13  ;;  %1547 = vrot.lane.b32.xlu1 %v3437_v54, %s2767_s23 }
 0x666   : > { %1585 = vrot.lane.b32.xlu0 %v3429_v51, %s2764_s13  ;;  %1579 = vrot.lane.b32.xlu1 %v3431_v52, %s2764_s13 }
 0x66a   : > { %1625 = vrot.lane.b32.xlu0 %v3423_v47, %s2765_s20  ;;  %1587 = vrot.lane.b32.xlu1 %v3437_v54, %s2764_s13  ;;  %s2171_s13 = sshll.u32 %s3770_s26, 4  ;;  %s3806_s13 = int_to_ptr.vmem [resolvable:$true] %s2171_s13 }
 0x66b   : > { %s2681_s21 = scalar_lea.vmem %s3806_s13, 2048  ;;  %p2688_p8 = scmp.lt.s32.totalorder %s3806_s13, %s2686_s19 }
 0x66c   : > { %p2682_p2 = scmp.ne.s32.totalorder %s3806_s13, %s2681_s21  ;;  %p2689_p11 = scmp.lt.s32.totalorder %s2687_s29, %s2681_s21 }
 0x66e   : > { %1633 = vrot.lane.b32.xlu0 %v3429_v51, %s2765_s20  ;;  %1627 = vrot.lane.b32.xlu1 %v3431_v52, %s2765_s20  ;;  %p2683_p4 = pnand %p2682_p2, %p3921_p3  ;;  %p2690_p13 = por %p2689_p11, %p2688_p8 }
 0x670   : > { %p2684_p7 = pneg %p2683_p4 }
 0x672   : > { %1665 = vrot.lane.b32.xlu0 %v3423_v47, %s2768_s25  ;;  %1635 = vrot.lane.b32.xlu1 %v3437_v54, %s2765_s20  ;;  %p2691_p1 = pnand %p2690_p13, %p2684_p7 }
 0x676   : > { %1673 = vrot.lane.b32.xlu0 %v3429_v51, %s2768_s25  ;;  %1667 = vrot.lane.b32.xlu1 %v3431_v52, %s2768_s25 }
 0x67a   : > { %1705 = vrot.lane.b32.xlu0 %v3423_v47, %s2770_s12  ;;  %1675 = vrot.lane.b32.xlu1 %v3437_v54, %s2768_s25  ;;  %s3804_s25 = scalar_lea.hbm %s3861_s8, %s2337_s10 }
 0x67e   : > { %1713 = vrot.lane.b32.xlu0 %v3429_v51, %s2770_s12  ;;  %1707 = vrot.lane.b32.xlu1 %v3431_v52, %s2770_s12 }
 0x682   : > { %1715 = vrot.lane.b32.xlu1 %v3437_v54, %s2770_s12  ;;  %2067 = vperm.xlu0 %2567, %v2061_v56  }
 0x686   : > { %2072 = vperm.xlu1 %2568, %v2062_v57   ;;  %2082 = vperm.xlu0 %2567, %v2064_v42  }
 0x68a   : > { %2077 = vperm.xlu1 %2568, %v2063_v62   ;;  %2112 = vperm.xlu0 %2567, %v2102_v36  }
 0x68e   : > { %2107 = vperm.xlu1 %2568, %v2101_v44   ;;  %2122 = vperm.xlu0 %2567, %v2104_v63  }
 0x692   : > { %2117 = vperm.xlu1 %2568, %v2103_v1   ;;  %v2315_v1 = vsel %vm1505_vm0, 1.0, %v3879_v0 }
 0x694   : > { %v1481_v45 = vpop.permute.xlu0 %1480 }
 0x698   : > { %v1489_v2 = vpop.permute.xlu0 %1488  ;;  %v1483_v58 = vpop.permute.xlu1 %1482 }
 0x69c   : > { %v1534_v60 = vpop.permute.xlu0 %1533  ;;  %v1491_v7 = vpop.permute.xlu1 %1490 }
 0x6a0   : > { %v3505_v8 = vpop.permute.xlu0 %1541  ;;  %v3507_v9 = vpop.permute.xlu1 %1535 }
 0x6a4   : > { %v3509_v13 = vpop.permute.xlu0 %1573  ;;  %v3511_v20 = vpop.permute.xlu1 %1543 }
 0x6a8   : > { %v3513_v21 = vpop.permute.xlu0 %1581  ;;  %v3515_v22 = vpop.permute.xlu1 %1575 }
 0x6ac   : > { %v3517_v25 = vpop.permute.xlu0 %1621  ;;  %v3519_v26 = vpop.permute.xlu1 %1583 }
 0x6b0   : > { %v3521_v27 = vpop.permute.xlu0 %1629  ;;  %v3523_v28 = vpop.permute.xlu1 %1623 }
 0x6b4   : > { %v3525_v29 = vpop.permute.xlu0 %1661  ;;  %v3527_v30 = vpop.permute.xlu1 %1631 }
 0x6b8   : > { %v3529_v31 = vpop.permute.xlu0 %1669  ;;  %v3531_v34 = vpop.permute.xlu1 %1663 }
 0x6bc   : > { %v3533_v46 = vpop.permute.xlu0 %1701  ;;  %v3535_v48 = vpop.permute.xlu1 %1671 }
 0x6bd   : > { %3903 = vst [vmem:[#allocation24_spill] sm:$0xff] %v3533_v46 }
 0x6c0   : > { %v3537_v50 = vpop.permute.xlu0 %1709  ;;  %v3539_v53 = vpop.permute.xlu1 %1703 }
 0x6c1   : > { %3904 = vst [vmem:[#allocation25_spill] sm:$0xff] %v3537_v50  ;;  %3905 = vst [vmem:[#allocation26_spill] sm:$0xff] %v3539_v53 }
 0x6c4   : > { %v1485_v56 = vpop.permute.xlu0 %1484  ;;  %v3543_v57 = vpop.permute.xlu1 %1711 }
 0x6c5   : > { %3906 = vst [vmem:[#allocation27_spill] sm:$0xff] %v3543_v57  ;;  %v1501_v42 = vsel %vm1496_vm14, %v1481_v45, %v1485_v56 }
 0x6c6   : > { %v1518_v63 = vmul.f32 %v2316_v59, %v1501_v42  ;;  %v1499_v42 = vsel %vm1496_vm14, %v1485_v56, %v1489_v2 }
 0x6c7   : > { %v1519_v0 = vmul.f32 %v2317_v11, %v1499_v42 }
 0x6c8   : > { %v1493_v62 = vpop.permute.xlu0 %1492  ;;  %v1487_v36 = vpop.permute.xlu1 %1486 }
 0x6c9   : > { %v1502_v44 = vsel %vm1496_vm14, %v1483_v58, %v1487_v36  ;;  %v1503_v49 = vsel %vm1496_vm14, %v1493_v62, %v1481_v45  ;;  %v1497_v53 = vsel %vm1496_vm14, %v1489_v2, %v1493_v62  ;;  %v1500_v57 = vsel %vm1496_vm14, %v1487_v36, %v1491_v7 }
 0x6ca   : > { %v1522_v43 = vmul.f32 %v2316_v59, %v1502_v44  ;;  %v1517_v5 = vmul.f32 %v2315_v1, %v1503_v49  ;;  %v1520_v44 = vmul.f32 %v2318_v40, %v1497_v53  ;;  %v1523_v62 = vmul.f32 %v2317_v11, %v1500_v57 }
 0x6cc   : > { %v1538_v12 = vpop.permute.xlu0 %1537  ;;  %v1495_v46 = vpop.permute.xlu1 %1494  ;;  %v2418_v50 = vpack.c.bf16 %v1522_v43, %v1518_v63 }
 0x6cd   : > { %v1498_v45 = vsel %vm1496_vm14, %v1491_v7, %v1495_v46  ;;  %v1504_v59 = vsel %vm1496_vm14, %v1495_v46, %v1483_v58  ;;  %v1553_v36 = vsel %vm893_vm2, %v1534_v60, %v1538_v12  ;;  %v2448_v7 = vpack.c.bf16 %v1523_v62, %v1519_v0 }
 0x6ce   : > { %v1521_v61 = vmul.f32 %v2315_v1, %v1504_v59  ;;  %v1524_v10 = vmul.f32 %v2318_v40, %v1498_v45  ;;  %2419 = vmatprep.subr.bf16.mxu0 %v2418_v50  ;;  %v1558_v58 = vmul.f32 %v3163_v3, %v1553_v36 }
 0x6d0   : > { %v2420_v43 = vpack.c.bf16 %v1521_v61, %v1517_v5  ;;  %v1546_v63 = vpop.permute.xlu0 %1545  ;;  %v1540_v55 = vpop.permute.xlu1 %1539  ;;  %v2446_v2 = vpack.c.bf16 %v1524_v10, %v1520_v44 }
 0x6d1   : > { %v1554_v49 = vsel %vm893_vm2, %v3507_v9, %v1540_v55  ;;  %v1555_v46 = vsel %vm893_vm2, %v1546_v63, %v1534_v60  ;;  %v1549_v11 = vsel %vm893_vm2, %v3505_v8, %v1546_v63  ;;  %v1552_v10 = vsel %vm893_vm2, %v1540_v55, %v3511_v20 }
 0x6d2   : > { %v1562_v40 = vmul.f32 %v3163_v3, %v1554_v49  ;;  %2421 = vmatpush1.bf16.msra.mxu0 %v2420_v43  ;;  %2447 = vmatprep.subr.bf16.mxu1 %v2446_v2  ;;  %v1551_v60 = vsel %vm893_vm2, %v1538_v12, %v3505_v8  ;;  %v1557_v3 = vmul.f32 %v3175_v14, %v1555_v46 }
 0x6d3   : > { %2449 = vmatpush1.bf16.msra.mxu1 %v2448_v7  ;;  %v1560_v55 = vmul.f32 %v3178_v19, %v1549_v11  ;;  %v1563_v56 = vmul.f32 %v3185_v23, %v1552_v10  ;;  %v1559_v8 = vmul.f32 %v3185_v23, %v1551_v60 }
 0x6d4   : > { %v1578_v61 = vpop.permute.xlu0 %1577  ;;  %v1548_v0 = vpop.permute.xlu1 %1547  ;;  %v2422_v5 = vpack.c.bf16 %v1562_v40, %v1558_v58 }
 0x6d5   : > { %v1550_v50 = vsel %vm893_vm2, %v3511_v20, %v1548_v0  ;;  %v1556_v53 = vsel %vm893_vm2, %v1548_v0, %v3507_v9  ;;  %v1593_v12 = vsel %vm422_vm4, %v3509_v13, %v1578_v61  ;;  %v2452_v44 = vpack.c.bf16 %v1563_v56, %v1559_v8 }
 0x6d6   : > { %v1561_v57 = vmul.f32 %v3175_v14, %v1556_v53  ;;  %v1564_v1 = vmul.f32 %v3178_v19, %v1550_v50  ;;  %2423 = vmatprep.subr.bf16.mxu0 %v2422_v5  ;;  %v1598_v14 = vmul.f32 %v3019_v15, %v1593_v12 }
 0x6d8   : > { %v2424_v20 = vpack.c.bf16 %v1561_v57, %v1557_v3  ;;  %v1586_v42 = vpop.permute.xlu0 %1585  ;;  %v1580_v45 = vpop.permute.xlu1 %1579  ;;  %v2450_v59 = vpack.c.bf16 %v1564_v1, %v1560_v55 }
 0x6d9   : > { %v1594_v9 = vsel %vm422_vm4, %v3515_v22, %v1580_v45  ;;  %v1595_v19 = vsel %vm422_vm4, %v1586_v42, %v3509_v13  ;;  %v1589_v23 = vsel %vm422_vm4, %v3513_v21, %v1586_v42  ;;  %v1592_v36 = vsel %vm422_vm4, %v1580_v45, %v3519_v26 }
 0x6da   : > { %v1602_v62 = vmul.f32 %v3019_v15, %v1594_v9  ;;  %2425 = vmatpush1.bf16.msra.mxu0 %v2424_v20  ;;  %2451 = vmatprep.subr.bf16.mxu1 %v2450_v59  ;;  %v1591_v13 = vsel %vm422_vm4, %v1578_v61, %v3513_v21  ;;  %v1597_v15 = vmul.f32 %v3025_v17, %v1595_v19 }
 0x6db   : > { %2453 = vmatpush1.bf16.msra.mxu1 %v2452_v44  ;;  %v1600_v58 = vmul.f32 %v3022_v16, %v1589_v23  ;;  %v1603_v46 = vmul.f32 %v3028_v18, %v1592_v36  ;;  %v1599_v10 = vmul.f32 %v3028_v18, %v1591_v13  ;;  %v3909_v44 = vld [vmem:[#allocation21_spill] sm:$0xff]  ;;  %v3910_v36 = vld [vmem:[#allocation18_spill] sm:$0xff] }
 0x6dc   : > { %v1626_v43 = vpop.permute.xlu0 %1625  ;;  %v1588_v63 = vpop.permute.xlu1 %1587  ;;  %v2426_v2 = vpack.c.bf16 %v1602_v62, %v1598_v14  ;;  %v3911_v13 = vld [vmem:[#allocation22_spill] sm:$0xff] }
 0x6dd   : > { %v1590_v49 = vsel %vm422_vm4, %v3519_v26, %v1588_v63  ;;  %v1596_v7 = vsel %vm422_vm4, %v1588_v63, %v3515_v22  ;;  %v1639_v21 = vsel %vm459_vm5, %v1626_v43, %v3521_v27  ;;  %v2456_v60 = vpack.c.bf16 %v1603_v46, %v1599_v10 }
 0x6de   : > { %v1601_v40 = vmul.f32 %v3025_v17, %v1596_v7  ;;  %v1604_v11 = vmul.f32 %v3022_v16, %v1590_v49  ;;  %2427 = vmatprep.subr.bf16.mxu0 %v2426_v2  ;;  %v2430_v16 = vpack.c.bf16 %v3431_v52, %v3423_v47  ;;  %v1641_v18 = vsel %vm459_vm5, %v3517_v25, %v1626_v43 }
 0x6df   : > { %v1646_v3 = vmul.f32 %v3057_v38, %v1639_v21  ;;  %v2458_v47 = vpack.c.bf16 %v3437_v54, %v3429_v51  ;;  %v1645_v1 = vmul.f32 %v3049_v35, %v1641_v18  ;;  %vm1717_vm4 = vcmp.lt.s32.totalorder %v3002_v6, 125  ;;  %v3919_v18 = vld [vmem:[#allocation26_spill] sm:$0xff]  ;;  %v1759_v6 = vld [vmem:[#allocation9 + $0x8] sm:$0xff] }
 0x6e0   : > { %v2428_v26 = vpack.c.bf16 %v1601_v40, %v1597_v15  ;;  %v1634_v61 = vpop.permute.xlu0 %1633  ;;  %v1628_v0 = vpop.permute.xlu1 %1627  ;;  %v2454_v5 = vpack.c.bf16 %v1604_v11, %v1600_v58  ;;  %v3912_v15 = vld [vmem:[#allocation23_spill] sm:$0xff]  ;;  %v3913_v46 = vmov 0.0  }
 0x6e1   : > { %v1640_v22 = vsel %vm459_vm5, %v1628_v0, %v3527_v30  ;;  %v1642_v17 = vsel %vm459_vm5, %v3523_v28, %v1628_v0  ;;  %v1637_v53 = vsel %vm459_vm5, %v3521_v27, %v1634_v61  ;;  %v1643_v55 = vsel %vm459_vm5, %v1634_v61, %v3517_v25  ;;  %v3916_v61 = vld [vmem:[#allocation20_spill] sm:$0xff]  ;;  %v3917_v0 = vld [vmem:[#allocation19_spill] sm:$0xff] }
 0x6e2   : > { %v1650_v50 = vmul.f32 %v3057_v38, %v1640_v22  ;;  %2429 = vmatpush1.bf16.msra.mxu0 %v2428_v26  ;;  %2455 = vmatprep.subr.bf16.mxu1 %v2454_v5  ;;  %v1649_v52 = vmul.f32 %v3049_v35, %v1642_v17  ;;  %v1647_v12 = vmul.f32 %v3060_v39, %v1637_v53  ;;  %v2319_v40 = vsel %vm1717_vm4, 1.0, %v3913_v46 }
 0x6e3   : > { %2431 = vmatprep.subr.bf16.mxu0 %v2430_v16  ;;  %2457 = vmatpush1.bf16.msra.mxu1 %v2456_v60  ;;  %v1648_v51 = vmul.f32 %v3054_v37, %v1643_v55  ;;  %v3907_v35 = vpack.c.bf16 %v3371_v33, %v3365_v24  ;;  %vm1728_vm2 = vcmp.lt.s32.totalorder %v3916_v61, 125  ;;  %v3918_v16 = vld [vmem:[#allocation27_spill] sm:$0xff] }
 0x6e4   : > { %v1666_v56 = vpop.permute.xlu0 %1665  ;;  %v1636_v57 = vpop.permute.xlu1 %1635  ;;  %v2434_v38 = vpack.c.bf16 %v1650_v50, %v1646_v3  ;;  %2459 = vmatprep.subr.bf16.mxu1 %v2458_v47  ;;  %v2436_v20 = vpack.c.bf16 %v1649_v52, %v1645_v1  ;;  %v2321_v52 = vsel %vm1728_vm2, 1.0, %v3913_v46 }
 0x6e5   : > { %v1638_v27 = vsel %vm459_vm5, %v3527_v30, %v1636_v57  ;;  %v1644_v25 = vsel %vm459_vm5, %v1636_v57, %v3523_v28  ;;  %v1679_v30 = vsel %vm970_vm9, %v1666_v56, %v3529_v31  ;;  %v1681_v28 = vsel %vm970_vm9, %v3525_v29, %v1666_v56 }
 0x6e6   : > { %v1651_v54 = vmul.f32 %v3060_v39, %v1638_v27  ;;  %v1652_v8 = vmul.f32 %v3054_v37, %v1644_v25  ;;  %2433 = vmatpush1.bf16.msra.mxu0 %v3907_v35  ;;  %v3908_v39 = vpack.c.bf16 %v3379_v41, %v3369_v32  ;;  %v1685_v9 = vmul.f32 %v3224_v4, %v1681_v28 }
 0x6e7   : > { %2435 = vmatprep.subr.bf16.mxu0 %v2434_v38  ;;  %v1686_v14 = vmul.f32 %v3909_v44, %v1679_v30  ;;  %vm1727_vm5 = vcmp.lt.s32.totalorder %v3910_v36, 125 }
 0x6e8   : > { %v2464_v42 = vpack.c.bf16 %v1651_v54, %v1647_v12  ;;  %2461 = vmatpush1.bf16.msra.mxu1 %v3908_v39  ;;  %v1674_v37 = vpop.permute.xlu0 %1673  ;;  %v1668_v45 = vpop.permute.xlu1 %1667  ;;  %v2462_v59 = vpack.c.bf16 %v1652_v8, %v1648_v51  ;;  %v2320_v11 = vsel %vm1727_vm5, 1.0, %v3913_v46  ;;  %v1758_v39 = vld [vmem:[#allocation9] sm:$0xff] }
 0x6e9   : > { %v1680_v24 = vsel %vm970_vm9, %v1668_v45, %v3535_v48  ;;  %v1682_v33 = vsel %vm970_vm9, %v3531_v34, %v1668_v45  ;;  %v1677_v41 = vsel %vm970_vm9, %v3529_v31, %v1674_v37  ;;  %v1683_v62 = vsel %vm970_vm9, %v1674_v37, %v3525_v29  ;;  %v1760_v37 = vld [vmem:[#allocation9 + $0x10] sm:$0xff]  ;;  %v1761_v45 = vld [vmem:[#allocation9 + $0x18] sm:$0xff] }
 0x6ea   : > { %v1689_v19 = vmul.f32 %v3224_v4, %v1682_v33  ;;  %v1690_v32 = vmul.f32 %v3909_v44, %v1680_v24  ;;  %2437 = vmatpush1.bf16.msra.mxu0 %v2436_v20  ;;  %2463 = vmatprep.subr.bf16.mxu1 %v2462_v59  ;;  %v1687_v29 = vmul.f32 %v3911_v13, %v1677_v41  ;;  %v3920_v20 = vmov 1.0  }
 0x6eb   : > { %v1688_v49 = vmul.f32 %v3912_v15, %v1683_v62 }
 0x6ec   : > { %v2440_v23 = vpack.c.bf16 %v1689_v19, %v1685_v9  ;;  %2465 = vmatpush1.bf16.msra.mxu1 %v2464_v42  ;;  %v1706_v43 = vpop.permute.xlu0 %1705  ;;  %v1676_v4 = vpop.permute.xlu1 %1675  ;;  %v2438_v63 = vpack.c.bf16 %v1690_v32, %v1686_v14 }
 0x6ed   : > { %v1678_v2 = vsel %vm970_vm9, %v3535_v48, %v1676_v4  ;;  %v1684_v31 = vsel %vm970_vm9, %v1676_v4, %v3531_v34  ;;  %v3914_v48 = vld [vmem:[#allocation25_spill] sm:$0xff]  ;;  %v3915_v34 = vld [vmem:[#allocation24_spill] sm:$0xff]  ;;  %vm1729_vm9 = vcmp.lt.s32.totalorder %v3917_v0, 125 }
 0x6ee   : > { %v1691_v7 = vmul.f32 %v3911_v13, %v1678_v2  ;;  %v1692_v58 = vmul.f32 %v3912_v15, %v1684_v31  ;;  %2439 = vmatprep.subr.bf16.mxu0 %v2438_v63  ;;  %v1720_v21 = vsel %vm1717_vm4, %v1706_v43, %v3914_v48  ;;  %v1722_v10 = vsel %vm1717_vm4, %v3915_v34, %v1706_v43 }
 0x6ef   : > { %2441 = vmatpush1.bf16.msra.mxu0 %v2440_v23  ;;  %v1738_v50 = vmul.f32 %v2319_v40, %v1722_v10  ;;  %v1739_v53 = vmul.f32 %v2320_v11, %v1720_v21  ;;  %v2322_v56 = vsel %vm1729_vm9, 1.0, %v3913_v46 }
 0x6f0   : > { %v2468_v26 = vpack.c.bf16 %v1691_v7, %v1687_v29  ;;  %v1714_v5 = vpop.permute.xlu0 %1713  ;;  %v1708_v22 = vpop.permute.xlu1 %1707  ;;  %v2466_v17 = vpack.c.bf16 %v1692_v58, %v1688_v49 }
 0x6f1   : > { %v1721_v60 = vsel %vm1717_vm4, %v1708_v22, %v3918_v16  ;;  %v1723_v3 = vsel %vm1717_vm4, %v3919_v18, %v1708_v22  ;;  %v1718_v57 = vsel %vm1717_vm4, %v3914_v48, %v1714_v5  ;;  %v1724_v38 = vsel %vm1717_vm4, %v1714_v5, %v3915_v34 }
 0x6f2   : > { %v1742_v55 = vmul.f32 %v2319_v40, %v1723_v3  ;;  %v1743_v47 = vmul.f32 %v2320_v11, %v1721_v60  ;;  %2467 = vmatprep.subr.bf16.mxu1 %v2466_v17  ;;  %v1740_v54 = vmul.f32 %v2321_v52, %v1718_v57  ;;  %v1741_v8 = vmul.f32 %v2322_v56, %v1724_v38 }
 0x6f3   : > { %2469 = vmatpush1.bf16.msra.mxu1 %v2468_v26 }
 0x6f4   : > { %v2444_v1 = vpack.c.bf16 %v1742_v55, %v1738_v50  ;;  %v1716_v27 = vpop.permute.xlu1 %1715  ;;  %v2442_v25 = vpack.c.bf16 %v1743_v47, %v1739_v53 }
 0x6f5   : > { %v1719_v12 = vsel %vm1717_vm4, %v3918_v16, %v1716_v27  ;;  %v1725_v51 = vsel %vm1717_vm4, %v1716_v27, %v3919_v18 }
 0x6f6   : > { %v1744_v35 = vmul.f32 %v2321_v52, %v1719_v12  ;;  %v1745_v30 = vmul.f32 %v2322_v56, %v1725_v51  ;;  %2443 = vmatprep.subr.bf16.mxu0 %v2442_v25 }
 0x6f7   : > { %2445 = vmatpush1.bf16.msra.mxu0 %v2444_v1 }
 0x6f8   : > { %v2472_v28 = vpack.c.bf16 %v1744_v35, %v1740_v54  ;;  %1863 = vmatprep.subr.mxu0 %v3920_v20  ;;  %v2470_v42 = vpack.c.bf16 %v1745_v30, %v1741_v8 }
 0x6fa   : > { %2471 = vmatprep.subr.bf16.mxu1 %v2470_v42 }
 0x6fb   : > { %1864 = vmatpush1.msra.mxu0 %v3920_v20  ;;  %2473 = vmatpush1.bf16.msra.mxu1 %v2472_v28 }
 0x6fc   : > { %2323 = vmatmul.mubr.msk.f32.vlgmr.msra.gmra.mrb[10].mxu0 %vm1822_vm6, %v1758_v39  ;;  %1952 = vmatprep.subr.mxu1 %v3920_v20 }
 0x6fd   : > { %1905 = vmatprep.mubr.f32.mxu0 %v3913_v46 }
 0x6ff   : > { %1953 = vmatpush1.msra.mxu1 %v3920_v20 }
 0x700   : > { %2324 = vmatmul.mubr.msk.f32.gmra.mrb[12].mxu0 %vm1822_vm6, %v1759_v6  ;;  %2327 = vmatmul.mubr.msk.f32.vlgmr.msra.gmra.mrb[10].mxu1 %vm1822_vm6, %v1758_v39 }
 0x701   : > { %1911 = vmatprep.mubr.f32.mxu0 %v3913_v46  ;;  %1994 = vmatprep.mubr.f32.mxu1 %v3913_v46  ;;  %v2068_v24 = vpop.permute.xlu0 %2067 }
 0x704   : > { %2325 = vmatmul.mubr.msk.f32.gmra.mrb[14].mxu0 %vm1822_vm6, %v1760_v37  ;;  %2328 = vmatmul.mubr.msk.f32.gmra.mrb[12].mxu1 %vm1822_vm6, %v1759_v6 }
 0x705   : > { %1917 = vmatprep.mubr.f32.mxu0 %v3913_v46  ;;  %2000 = vmatprep.mubr.f32.mxu1 %v3913_v46  ;;  %v3756_v59 = vpop.permute.xlu1 %2072  ;;  %v3761_v14 = vpop.permute.xlu0 %2082 }
 0x708   : > { %2326 = vmatmul.mubr.msk.f32.gmra.mrb[16].mxu0 %vm1822_vm6, %v1761_v45  ;;  %2329 = vmatmul.mubr.msk.f32.gmra.mrb[14].mxu1 %vm1822_vm6, %v1760_v37 }
 0x709   : > { %2006 = vmatprep.mubr.f32.mxu1 %v3913_v46  ;;  %v3758_v33 = vpop.permute.xlu1 %2077  ;;  %v2113_v58 = vpop.permute.xlu0 %2112 }
 0x70c   : > { %2330 = vmatmul.mubr.msk.f32.gmra.mrb[16].mxu1 %vm1822_vm6, %v1761_v45 }
 0x70d   : > { %v2108_v62 = vpop.permute.xlu1 %2107 }
 0x711   : > { %v2118_v54 = vpop.permute.xlu1 %2117 }
 0x7cf   : > { %v1901_v9 = vpop.f32.mrb[10].mxu0 }
 0x7d0   : > { %vm2013_vm7 = vcmp.gt.f32.partialorder %v1901_v9, 0.0  ;;  %v2029_v44 = vmul.f32 0.01, %v1901_v9  ;;  %v1903_v19 = vpop.f32.mrb[11].mxu0 }
 0x7d1   : > { %vm2014_vm8 = vcmp.gt.f32.partialorder %v1903_v19, 0.0  ;;  %v2030_v32 = vmul.f32 0.01, %v1903_v19 }
 0x7d2   : > { %v2045_v41 = vsel %vm2013_vm7, %v1901_v9, %v2029_v44 }
 0x7d3   : > { %v2085_v23 = vmul.f32 %v2068_v24, %v2045_v41  ;;  %v2046_v36 = vsel %vm2014_vm8, %v1903_v19, %v2030_v32  ;;  %v1907_v43 = vpop.f32.mrb[12].mxu0  ;;  %v1990_v4 = vpop.f32.mrb[10].mxu1 }
 0x7d4   : > { %v2086_v63 = vmul.f32 %v2068_v24, %v2046_v36  ;;  %vm2017_vm10 = vcmp.gt.f32.partialorder %v1907_v43, 0.0  ;;  %v2033_v2 = vmul.f32 0.01, %v1907_v43  ;;  %vm2015_vm11 = vcmp.gt.f32.partialorder %v1990_v4, 0.0  ;;  %v1909_v31 = vpop.f32.mrb[13].mxu0  ;;  %v1992_v13 = vpop.f32.mrb[11].mxu1 }
 0x7d5   : > { %v2031_v29 = vmul.f32 0.01, %v1990_v4  ;;  %vm2018_vm12 = vcmp.gt.f32.partialorder %v1909_v31, 0.0  ;;  %v2034_v15 = vmul.f32 0.01, %v1909_v31  ;;  %vm2016_vm13 = vcmp.gt.f32.partialorder %v1992_v13, 0.0  ;;  %v2123_v41 = vpop.permute.xlu0 %2122 }
 0x7d6   : > { %v2049_v49 = vsel %vm2017_vm10, %v1907_v43, %v2033_v2  ;;  %v2032_v7 = vmul.f32 0.01, %v1992_v13  ;;  %v2125_v46 = vadd.f32 %v2108_v62, %v2085_v23  ;;  %v2126_v40 = vadd.f32 %v2108_v62, %v2086_v63 }
 0x7d7   : > { %v2089_v11 = vmul.f32 %v3756_v59, %v2049_v49  ;;  %v2047_v48 = vsel %vm2015_vm11, %v1990_v4, %v2031_v29  ;;  %v2050_v21 = vsel %vm2018_vm12, %v1909_v31, %v2034_v15  ;;  %v1913_v34 = vpop.f32.mrb[14].mxu0  ;;  %v1996_v10 = vpop.f32.mrb[12].mxu1 }
 0x7d8   : > { %v2087_v26 = vmul.f32 %v2068_v24, %v2047_v48  ;;  %v2090_v61 = vmul.f32 %v3756_v59, %v2050_v21  ;;  %v2048_v0 = vsel %vm2016_vm13, %v1992_v13, %v2032_v7  ;;  %2141 = vst [vmem:[%s3770_s26] sm:$0xff] %v2125_v46  ;;  %2142 = vst [vmem:[%s3770_s26 + $0x8] sm:$0xff] %v2126_v40  ;;  %vm2021_vm14 = vcmp.gt.f32.partialorder %v1913_v34, 0.0  ;;  %v1915_v5 = vpop.f32.mrb[15].mxu0  ;;  %v1998_v22 = vpop.f32.mrb[13].mxu1 }
 0x7d9   : > { %v2088_v17 = vmul.f32 %v2068_v24, %v2048_v0  ;;  %v2129_v16 = vadd.f32 %v2113_v58, %v2089_v11  ;;  %v2037_v60 = vmul.f32 0.01, %v1913_v34  ;;  %vm2019_vm15 = vcmp.gt.f32.partialorder %v1996_v10, 0.0 }
 0x7da   : > { %v2130_v18 = vadd.f32 %v2113_v58, %v2090_v61  ;;  %v2127_v3 = vadd.f32 %v2108_v62, %v2087_v26  ;;  %v2035_v50 = vmul.f32 0.01, %v1996_v10  ;;  %vm2022_vm0 = vcmp.gt.f32.partialorder %v1915_v5, 0.0 }
 0x7db   : > { %2145 = vst [vmem:[%s3770_s26 + $0x20] sm:$0xff] %v2129_v16  ;;  %v2128_v53 = vadd.f32 %v2108_v62, %v2088_v17  ;;  %v2053_v55 = vsel %vm2021_vm14, %v1913_v34, %v2037_v60  ;;  %v2038_v47 = vmul.f32 0.01, %v1915_v5  ;;  %vm2020_vm1 = vcmp.gt.f32.partialorder %v1998_v22, 0.0  ;;  %v1919_v52 = vpop.f32.mrb[16].mxu0  ;;  %v2002_v56 = vpop.f32.mrb[14].mxu1 }
 0x7dc   : > { %2146 = vst [vmem:[%s3770_s26 + $0x28] sm:$0xff] %v2130_v18  ;;  %2143 = vst [vmem:[%s3770_s26 + $0x10] sm:$0xff] %v2127_v3  ;;  %v2093_v57 = vmul.f32 %v3758_v33, %v2053_v55  ;;  %v2051_v38 = vsel %vm2019_vm15, %v1996_v10, %v2035_v50  ;;  %v2036_v1 = vmul.f32 0.01, %v1998_v22  ;;  %vm2025_vm3 = vcmp.gt.f32.partialorder %v1919_v52, 0.0  ;;  %v1921_v27 = vpop.f32.mrb[17].mxu0 }
 0x7dd   : > { %v2004_v25 = vpop.f32.mrb[15].mxu1  ;;  %2144 = vst [vmem:[%s3770_s26 + $0x18] sm:$0xff] %v2128_v53  ;;  %v2091_v12 = vmul.f32 %v3756_v59, %v2051_v38  ;;  %v2054_v51 = vsel %vm2022_vm0, %v1915_v5, %v2038_v47  ;;  %v2041_v8 = vmul.f32 0.01, %v1919_v52  ;;  %vm2023_vm4 = vcmp.gt.f32.partialorder %v2002_v56, 0.0 }
 0x7de   : > { %v2094_v35 = vmul.f32 %v3758_v33, %v2054_v51  ;;  %v2052_v30 = vsel %vm2020_vm1, %v1998_v22, %v2036_v1  ;;  %v2133_v28 = vadd.f32 %v2118_v54, %v2093_v57  ;;  %v2039_v20 = vmul.f32 0.01, %v2002_v56 }
 0x7df   : > { %v2131_v42 = vadd.f32 %v2113_v58, %v2091_v12  ;;  %v2092_v39 = vmul.f32 %v3756_v59, %v2052_v30  ;;  %v2057_v6 = vsel %vm2025_vm3, %v1919_v52, %v2041_v8  ;;  %vm2026_vm5 = vcmp.gt.f32.partialorder %v1921_v27, 0.0  ;;  %v2008_v37 = vpop.f32.mrb[16].mxu1 }
 0x7e0   : > { %v2134_v45 = vadd.f32 %v2118_v54, %v2094_v35  ;;  %2149 = vst [vmem:[%s3770_s26 + $0x40] sm:$0xff] %v2133_v28  ;;  %v2097_v24 = vmul.f32 %v3761_v14, %v2057_v6  ;;  %v2055_v9 = vsel %vm2023_vm4, %v2002_v56, %v2039_v20  ;;  %v2042_v44 = vmul.f32 0.01, %v1921_v27  ;;  %v2010_v19 = vpop.f32.mrb[17].mxu1 }
 0x7e1   : > { %2147 = vst [vmem:[%s3770_s26 + $0x30] sm:$0xff] %v2131_v42  ;;  %v2132_v32 = vadd.f32 %v2113_v58, %v2092_v39  ;;  %v2095_v62 = vmul.f32 %v3758_v33, %v2055_v9  ;;  %vm2024_vm2 = vcmp.gt.f32.partialorder %v2004_v25, 0.0  ;;  %v2040_v59 = vmul.f32 0.01, %v2004_v25 }
 0x7e2   : > { %2150 = vst [vmem:[%s3770_s26 + $0x48] sm:$0xff] %v2134_v45  ;;  %v2137_v23 = vadd.f32 %v2123_v41, %v2097_v24  ;;  %v2058_v36 = vsel %vm2026_vm5, %v1921_v27, %v2042_v44  ;;  %vm2027_vm9 = vcmp.gt.f32.partialorder %v2008_v37, 0.0  ;;  %v2043_v43 = vmul.f32 0.01, %v2008_v37 }
 0x7e3   : > { %2148 = vst [vmem:[%s3770_s26 + $0x38] sm:$0xff] %v2132_v32  ;;  %v2135_v4 = vadd.f32 %v2118_v54, %v2095_v62  ;;  %v2098_v63 = vmul.f32 %v3761_v14, %v2058_v36  ;;  %v2056_v2 = vsel %vm2024_vm2, %v2004_v25, %v2040_v59  ;;  %vm2028_vm6 = vcmp.gt.f32.partialorder %v2010_v19, 0.0 }
 0x7e4   : > { %2153 = vst [vmem:[%s3770_s26 + $0x60] sm:$0xff] %v2137_v23  ;;  %v2096_v31 = vmul.f32 %v3758_v33, %v2056_v2  ;;  %v2059_v13 = vsel %vm2027_vm9, %v2008_v37, %v2043_v43  ;;  %v2044_v29 = vmul.f32 0.01, %v2010_v19 }
 0x7e5   : > { %2151 = vst [vmem:[%s3770_s26 + $0x50] sm:$0xff] %v2135_v4  ;;  %v2138_v15 = vadd.f32 %v2123_v41, %v2098_v63  ;;  %v2099_v49 = vmul.f32 %v3761_v14, %v2059_v13 }
 0x7e6   : > { %v2136_v7 = vadd.f32 %v2118_v54, %v2096_v31  ;;  %v2060_v58 = vsel %vm2028_vm6, %v2010_v19, %v2044_v29 }
 0x7e7   : > { %2154 = vst [vmem:[%s3770_s26 + $0x68] sm:$0xff] %v2138_v15  ;;  %v2139_v46 = vadd.f32 %v2123_v41, %v2099_v49  ;;  %v2100_v40 = vmul.f32 %v3761_v14, %v2060_v58 }
 0x7e8   : > { %2152 = vst [vmem:[%s3770_s26 + $0x58] sm:$0xff] %v2136_v7 }
 0x7e9   : > { %2155 = vst [vmem:[%s3770_s26 + $0x70] sm:$0xff] %v2139_v46  ;;  %v2140_v33 = vadd.f32 %v2123_v41, %v2100_v40 }
 0x7eb   : > { %2156 = vst [vmem:[%s3770_s26 + $0x78] sm:$0xff] %v2140_v33 }
 0x7ec   : > { %2694 = shalt.err (!%p2691_p1)
}
 0x7ed   : > { %s2695_s14 = scalar_lea.hbm %s3804_s25, 2048  ;;  %s2699_s22 = scalar_lea.hbm %s3861_s8, 4096 }
 0x7ee   : > { %p2696_p0 = scmp.ne.s32.totalorder %s3804_s25, %s2695_s14  ;;  %p2700_p9 = scmp.lt.u32.totalorder %s3804_s25, %s3861_s8 }
 0x7ef   : > { %p2701_p12 = scmp.lt.u32.totalorder %s2699_s22, %s2695_s14  ;;  %p2703_p2 = scmp.lt.u32.totalorder %s2695_s14, %s3804_s25 }
 0x7f0   : > { %p2697_p6 = pnand %p2696_p0, %p3921_p3 }
 0x7f1   : > { %p2702_p10 = por %p2701_p12, %p2700_p9 }
 0x7f2   : > { %p2698_p5 = pneg %p2697_p6 }
 0x7f3   : > { %p2704_p4 = por %p2703_p2, %p2702_p10 }
 0x7f5   : > { %p2705_p7 = pnand %p2704_p4, %p2698_p5 }
 0x7f7   : > { %2708 = shalt.err (!%p2705_p7)
}
 0x7f8   : > { %s2773_s10 = smov 512   ;;  %s2774_s20 = smov 32  }
 0x7f9   : > { %2490 = dma.vmem_to_hbm [thread:$0]  (%p3921_p3), %s3806_s13, 2048, %s3804_s25, %s3812_s9, %s2773_s10, %s2773_s10, %s2774_s20  }
 0x7fa PF: > { %p2517_p8 = scmp.ge.s32.totalorder %s2755_s30, 2  ;;  %s2186_s23 = sand.u32 1, %s2743_s27  }
 0x7fb   : > { %p3922_p11 = scmp.ne.s32.totalorder %s3886_s16, 0  ;;  %s2187_s21 = scalar_lea.sflag [#allocation5], %s2186_s23 }
 0x7fd   : > { %p2506_p13 = pnand %p2517_p8, %p3922_p11 }
 0x7ff   : > { %2738 = dma.done.wait (!%p2506_p13), %s2187_s21, 2048  }
 0x800   : > { %2740 = vsyncadd (!%p2506_p13), %s2187_s21, 4294965248  ;;  %s3923_s24 = sld [smem:[#allocation16_spill]]  ;;  %s3924_s29 = sld [smem:[#allocation17_spill]] }
 0x801   : > { %p21_p1 = scmp.ge.s32.totalorder %s2845_s11, 4   ;;  %s3925_s27 = smov %s2747_s28 }
 0x802   : > { %s3927_s30 = smov %s2845_s11 }
 0x803   :  { %23 = sbr.rel (!%p21_p1) target bundleno = 6 (0x6), region = 104 }
 0x806   : > { %s3926_s28 = smov %s3923_s24 }
 0x80a   :  { %2192 = vsyncpa [#allocation4], 1 }
 0x80b   :  { %2194 = vsyncpa [#allocation4 + $0x1], 1 }
 0x80c   :  { %2195 = vsyncpa [#allocation7], 1 }
 0x80d   :  { %2196 = vsyncpa [#allocation10], 1 }
 0x80e   :  { %2197 = vsyncpa [#allocation5], 1 }
 0x80f   :  { %2199 = vsyncpa [#allocation5 + $0x1], 1 }

</bundles_post_ra>
